<compile_context>
chip_gen: v5e
topology: v5e:2x2
jax: 0.10.0
libtpu: 0.0.40
codegen_flags: <defaults>
</compile_context>

<pallas_src>
import math
import functools

import jax
import jax.numpy as jnp
from jax.experimental import pallas as pl
from jax.experimental.pallas import tpu as pltpu

D_MODEL = 32
NHEAD = 4
HEAD_DIM = D_MODEL // NHEAD
DIM_FF = 64
LN_EPS = 1e-5  # PyTorch LayerNorm default


# ---------------------------------------------------------------------------
# Fused decoder-layer kernel (single grid step, batch folded into rows)
# ---------------------------------------------------------------------------
def _decoder_layer_kernel(tgt_ref, qpos_ref, mem_ref, pos_ref,
                          sa_w_ref, sa_b_ref, ca_w_ref, ca_b_ref,
                          w1_ref, b1_ref, w2_ref, b2_ref,
                          ln_g_ref, ln_b_ref,
                          out_ref, attn_ref,
                          *, nhead, head_dim, batch, t_len, s_len):
    D = nhead * head_dim

    # Whole-slab loads (batch-major rows): (B*T, D) / (B*S, D).
    tgt = tgt_ref[...]
    qpos = qpos_ref[...]
    mem = mem_ref[...]
    pos = pos_ref[...]

    # Hoist all weight loads / parameter slices out of the unrolled loops.
    sa_w = sa_w_ref[...]; sa_b = sa_b_ref[...]          # (D, 4D), (1, 4D)
    ca_w = ca_w_ref[...]; ca_b = ca_b_ref[...]
    w1 = w1_ref[...];   b1 = b1_ref[...]                # (D, FF), (1, FF)
    w2 = w2_ref[...];   b2 = b2_ref[...]                # (FF, D), (1, D)
    ln_g = ln_g_ref[...]; ln_b = ln_b_ref[...]          # (3, D)
    g1, g2, g3 = ln_g[0:1, :], ln_g[1:2, :], ln_g[2:3, :]
    e1, e2, e3 = ln_b[0:1, :], ln_b[1:2, :], ln_b[2:3, :]

    def layer_norm(y, g, be):
        mu = jnp.mean(y, axis=-1, keepdims=True)
        var = jnp.mean((y - mu) ** 2, axis=-1, keepdims=True)
        # rsqrt -> EUP slot instead of a VALU divide.
        return (y - mu) * jax.lax.rsqrt(var + LN_EPS) * g + be

    def mha(q_in, k_in, v_in, w, bias, kv_len, want_attn):
        # w = [Wq^T*scale | Wk^T | Wv^T | Wo^T]  (D, 4D);  bias = (1, 4D).
        # Projections run once over ALL batch rows (batch folded into sublanes).
        q = jnp.dot(q_in, w[:, 0 * D:1 * D],
                    preferred_element_type=jnp.float32) + bias[:, 0 * D:1 * D]
        k = jnp.dot(k_in, w[:, 1 * D:2 * D],
                    preferred_element_type=jnp.float32) + bias[:, 1 * D:2 * D]
        v = jnp.dot(v_in, w[:, 2 * D:3 * D],
                    preferred_element_type=jnp.float32) + bias[:, 2 * D:3 * D]
        wo = w[:, 3 * D:4 * D]
        bo = bias[:, 3 * D:4 * D]

        o = jnp.zeros((batch * t_len, D), jnp.float32)
        attn_acc = ([jnp.zeros((t_len, kv_len), jnp.float32) for _ in range(batch)]
                    if want_attn else None)

        for h in range(nhead):                               # static unroll
            lo = h * head_dim
            hi = lo + head_dim
            hv_rows = []
            for b in range(batch):                           # static unroll
                qr = q[b * t_len:(b + 1) * t_len, lo:hi]      # (T, hd)
                kr = k[b * kv_len:(b + 1) * kv_len, lo:hi]    # (S, hd)
                vr = v[b * kv_len:(b + 1) * kv_len, lo:hi]    # (S, hd)
                # Contraction over the head dim -- no materialized K transpose.
                s = jnp.einsum('qe,ke->qk', qr, kr,
                               preferred_element_type=jnp.float32)
                s = s - jnp.max(s, axis=-1, keepdims=True)
                e = jnp.exp(s)
                p = e / jnp.sum(e, axis=-1, keepdims=True)   # exact: weights returned
                if want_attn:
                    attn_acc[b] = attn_acc[b] + p
                hv_rows.append(jnp.dot(p, vr, preferred_element_type=jnp.float32))
            # Row-concat across batches (sublane placement), then ONE matmul per
            # head against this head's Wo^T rows -> no per-(batch,head) projection.
            hv = jnp.concatenate(hv_rows, axis=0) if batch > 1 else hv_rows[0]
            o = o + jnp.dot(hv, wo[lo:hi, :], preferred_element_type=jnp.float32)
        o = o + bo

        if want_attn:
            attn = jnp.concatenate(attn_acc, axis=0) if batch > 1 else attn_acc[0]
        else:
            attn = None
        return o, attn

    # --- self-attention + residual + norm1 (attn weights discarded) ---
    x_qk = tgt + qpos
    sa_o, _ = mha(x_qk, x_qk, tgt, sa_w, sa_b, t_len, want_attn=False)
    t1 = layer_norm(tgt + sa_o, g1, e1)

    # --- cross-attention + residual + norm2 ---
    ca_o, attn = mha(t1 + qpos, mem + pos, mem, ca_w, ca_b, s_len, want_attn=True)
    t2 = layer_norm(t1 + ca_o, g2, e2)

    # --- FFN (linear1 -> relu -> linear2) + residual + norm3 ---
    hid = jnp.maximum(
        jnp.dot(t2, w1, preferred_element_type=jnp.float32) + b1, 0.0)
    ff = jnp.dot(hid, w2, preferred_element_type=jnp.float32) + b2
    t3 = layer_norm(t2 + ff, g3, e3)

    out_ref[...] = t3.astype(out_ref.dtype)                       # (B*T, D)
    attn_ref[...] = (attn * (1.0 / nhead)).astype(attn_ref.dtype)  # (B*T, S)


# ---------------------------------------------------------------------------
# Wrapper
# ---------------------------------------------------------------------------
def _full_spec(shape):
    nd = len(shape)
    return pl.BlockSpec(tuple(shape), lambda i, _nd=nd: (0,) * _nd)


def transformer_decoder_layer_forward(tgt, memory, query_pos, pos, kparams):
    """forward_post: self-attn -> norm1 -> cross-attn -> norm2 -> FFN -> norm3.

    tgt/query_pos: (T, B, D); memory/pos: (S, B, D) (sequence-first, like PyTorch).
    Returns (tgt_out (T, B, D), head-averaged cross-attn weights (B, T, S)).
    """
    T, B, D = tgt.shape
    S = memory.shape[0]

    # Layout plumbing: batch-major, sublane/lane-dense 2D slabs for the kernel.
    def to_rows(x, L):
        return jnp.transpose(x, (1, 0, 2)).reshape(B * L, D)

    tgt2d = to_rows(tgt, T)
    qpos2d = to_rows(query_pos, T)
    mem2d = to_rows(memory, S)
    pos2d = to_rows(pos, S)

    kernel = functools.partial(_decoder_layer_kernel, nhead=NHEAD,
                               head_dim=HEAD_DIM, batch=B, t_len=T, s_len=S)

    out2d, attn2d = pl.pallas_call(
        kernel,
        out_shape=(jax.ShapeDtypeStruct((B * T, D), jnp.float32),
                   jax.ShapeDtypeStruct((B * T, S), jnp.float32)),
        grid=(1,),  # single step: no duplicated K/V work, no per-step overhead
        in_specs=[
            _full_spec((B * T, D)),                 # tgt rows
            _full_spec((B * T, D)),                 # query_pos rows
            _full_spec((B * S, D)),                 # memory rows
            _full_spec((B * S, D)),                 # pos rows
            _full_spec(kparams['sa_w'].shape), _full_spec(kparams['sa_b'].shape),
            _full_spec(kparams['ca_w'].shape), _full_spec(kparams['ca_b'].shape),
            _full_spec(kparams['w1_t'].shape), _full_spec(kparams['b1'].shape),
            _full_spec(kparams['w2_t'].shape), _full_spec(kparams['b2'].shape),
            _full_spec(kparams['ln_g'].shape), _full_spec(kparams['ln_b'].shape),
        ],
        out_specs=(pl.BlockSpec((B * T, D), lambda i: (0, 0)),
                   pl.BlockSpec((B * T, S), lambda i: (0, 0))),
        compiler_params=pltpu.CompilerParams(dimension_semantics=("arbitrary",)),
    )(tgt2d, qpos2d, mem2d, pos2d,
      kparams['sa_w'], kparams['sa_b'], kparams['ca_w'], kparams['ca_b'],
      kparams['w1_t'], kparams['b1'], kparams['w2_t'], kparams['b2'],
      kparams['ln_g'], kparams['ln_b'])

    # Back to PyTorch layouts: output (T, B, D); attn already batch-major -> (B, T, S).
    out = jnp.transpose(out2d.reshape(B, T, D), (1, 0, 2))
    attn = attn2d.reshape(B, T, S)
    return out, attn


# ---------------------------------------------------------------------------
# Parameter init (PyTorch layout) + host-side packing for the kernel
# ---------------------------------------------------------------------------
def init_params(key):
    def lin(k, out_d, in_d, scale=0.05):
        kw, kb = jax.random.split(k)
        w = jax.random.normal(kw, (out_d, in_d), jnp.float32) * scale
        b = jax.random.normal(kb, (1, out_d), jnp.float32) * scale
        return w, b

    ks = jax.random.split(key, 10)
    p = {}
    p['sa_wq'], p['sa_bq'] = lin(ks[0], D_MODEL, D_MODEL)
    p['sa_wk'], p['sa_bk'] = lin(ks[1], D_MODEL, D_MODEL)
    p['sa_wv'], p['sa_bv'] = lin(ks[2], D_MODEL, D_MODEL)
    p['sa_wo'], p['sa_bo'] = lin(ks[3], D_MODEL, D_MODEL)
    p['ca_wq'], p['ca_bq'] = lin(ks[4], D_MODEL, D_MODEL)
    p['ca_wk'], p['ca_bk'] = lin(ks[5], D_MODEL, D_MODEL)
    p['ca_wv'], p['ca_bv'] = lin(ks[6], D_MODEL, D_MODEL)
    p['ca_wo'], p['ca_bo'] = lin(ks[7], D_MODEL, D_MODEL)
    p['w1'], p['b1'] = lin(ks[8], DIM_FF, D_MODEL)
    p['w2'], p['b2'] = lin(ks[9], D_MODEL, DIM_FF)
    for n in ('norm1', 'norm2', 'norm3'):
        p[n + '_g'] = jnp.ones((1, D_MODEL), jnp.float32)
        p[n + '_b'] = jnp.zeros((1, D_MODEL), jnp.float32)
    return p


def prepare_kernel_params(p):
    """Pre-transpose weights to (in, out), fold 1/sqrt(head_dim) into Wq/bq,
    pack each attention's matrices into a single lane-dense (D, 4D) slab."""
    scale = 1.0 / math.sqrt(HEAD_DIM)

    def pack(prefix):
        w = jnp.concatenate([p[prefix + '_wq'].T * scale, p[prefix + '_wk'].T,
                             p[prefix + '_wv'].T, p[prefix + '_wo'].T], axis=1)
        b = jnp.concatenate([p[prefix + '_bq'] * scale, p[prefix + '_bk'],
                             p[prefix + '_bv'], p[prefix + '_bo']], axis=1)
        return w, b

    kp = {}
    kp['sa_w'], kp['sa_b'] = pack('sa')
    kp['ca_w'], kp['ca_b'] = pack('ca')
    kp['w1_t'] = p['w1'].T
    kp['b1'] = p['b1']
    kp['w2_t'] = p['w2'].T
    kp['b2'] = p['b2']
    kp['ln_g'] = jnp.concatenate([p['norm1_g'], p['norm2_g'], p['norm3_g']], axis=0)
    kp['ln_b'] = jnp.concatenate([p['norm1_b'], p['norm2_b'], p['norm3_b']], axis=0)
    return kp


# ---------------------------------------------------------------------------
# Plain-JAX reference (for verification)
# ---------------------------------------------------------------------------
def _ref_mha(q_in, k_in, v_in, wq, bq, wk, bk, wv, bv, wo, bo):
    B, L, D = q_in.shape
    S = k_in.shape[1]
    q = q_in @ wq.T + bq[0]
    k = k_in @ wk.T + bk[0]
    v = v_in @ wv.T + bv[0]
    qh = q.reshape(B, L, NHEAD, HEAD_DIM).transpose(0, 2, 1, 3) / math.sqrt(HEAD_DIM)
    kh = k.reshape(B, S, NHEAD, HEAD_DIM).transpose(0, 2, 1, 3)
    vh = v.reshape(B, S, NHEAD, HEAD_DIM).transpose(0, 2, 1, 3)
    s = jnp.einsum('bhld,bhsd->bhls', qh, kh)
    pw = jax.nn.softmax(s, axis=-1)
    o = jnp.einsum('bhls,bhsd->bhld', pw, vh).transpose(0, 2, 1, 3).reshape(B, L, D)
    return o @ wo.T + bo[0], pw.mean(axis=1)


def _ref_ln(x, gamma, beta):
    mean = x.mean(-1, keepdims=True)
    var = ((x - mean) ** 2).mean(-1, keepdims=True)
    return (x - mean) / jnp.sqrt(var + LN_EPS) * gamma[0] + beta[0]


def _ref_forward(tgt, memory, query_pos, pos, p):
    tgt_b = jnp.transpose(tgt, (1, 0, 2))
    mem_b = jnp.transpose(memory, (1, 0, 2))
    qpos_b = jnp.transpose(query_pos, (1, 0, 2))
    pos_b = jnp.transpose(pos, (1, 0, 2))
    qk = tgt_b + qpos_b
    o, _ = _ref_mha(qk, qk, tgt_b, p['sa_wq'], p['sa_bq'], p['sa_wk'], p['sa_bk'],
                    p['sa_wv'], p['sa_bv'], p['sa_wo'], p['sa_bo'])
    t1 = _ref_ln(tgt_b + o, p['norm1_g'], p['norm1_b'])
    o, attn = _ref_mha(t1 + qpos_b, mem_b + pos_b, mem_b, p['ca_wq'], p['ca_bq'],
                       p['ca_wk'], p['ca_bk'], p['ca_wv'], p['ca_bv'],
                       p['ca_wo'], p['ca_bo'])
    t2 = _ref_ln(t1 + o, p['norm2_g'], p['norm2_b'])
    h = jnp.maximum(t2 @ p['w1'].T + p['b1'][0], 0.0)
    y = h @ p['w2'].T + p['b2'][0]
    t3 = _ref_ln(t2 + y, p['norm3_g'], p['norm3_b'])
    return jnp.transpose(t3, (1, 0, 2)), attn


if __name__ == "__main__":
    key = jax.random.PRNGKey(0)
    k_tgt, k_mem, k_qp, k_pos, k_par = jax.random.split(key, 5)

    T, B, S_MEM = 8, 2, 16
    tgt = jax.random.normal(k_tgt, (T, B, D_MODEL), jnp.float32)
    memory = jax.random.normal(k_mem, (S_MEM, B, D_MODEL), jnp.float32)
    query_pos = jax.random.normal(k_qp, (T, B, D_MODEL), jnp.float32)
    pos = jax.random.normal(k_pos, (S_MEM, B, D_MODEL), jnp.float32)
    params = init_params(k_par)
    kparams = prepare_kernel_params(params)

    fwd = jax.jit(transformer_decoder_layer_forward)
    out, attn = fwd(tgt, memory, query_pos, pos, kparams)
    out = jax.block_until_ready(out)
    attn = jax.block_until_ready(attn)

    ref_out, ref_attn = _ref_forward(tgt, memory, query_pos, pos, params)
    assert out.shape == (T, B, D_MODEL) and attn.shape == (B, T, S_MEM)
    assert jnp.allclose(out, ref_out, atol=1e-4, rtol=1e-4), \
        float(jnp.max(jnp.abs(out - ref_out)))
    assert jnp.allclose(attn, ref_attn, atol=1e-4, rtol=1e-4), \
        float(jnp.max(jnp.abs(attn - ref_attn)))

    print("KERNEL_OK")
</pallas_src>

<mosaic_0001>
module attributes {stable_mosaic.version = 11 : i64} {
  func.func @_decoder_layer_kernel(%arg0: i32, %arg1: memref<16x32xf32, #tpu.memory_space<vmem>>, %arg2: memref<16x32xf32, #tpu.memory_space<vmem>>, %arg3: memref<32x32xf32, #tpu.memory_space<vmem>>, %arg4: memref<32x32xf32, #tpu.memory_space<vmem>>, %arg5: memref<32x128xf32, #tpu.memory_space<vmem>>, %arg6: memref<1x128xf32, #tpu.memory_space<vmem>>, %arg7: memref<32x128xf32, #tpu.memory_space<vmem>>, %arg8: memref<1x128xf32, #tpu.memory_space<vmem>>, %arg9: memref<32x64xf32, #tpu.memory_space<vmem>>, %arg10: memref<1x64xf32, #tpu.memory_space<vmem>>, %arg11: memref<64x32xf32, #tpu.memory_space<vmem>>, %arg12: memref<1x32xf32, #tpu.memory_space<vmem>>, %arg13: memref<3x32xf32, #tpu.memory_space<vmem>>, %arg14: memref<3x32xf32, #tpu.memory_space<vmem>>, %arg15: memref<16x32xf32, #tpu.memory_space<vmem>>, %arg16: memref<16x16xf32, #tpu.memory_space<vmem>>) attributes {dimension_semantics = [#tpu.dimension_semantics<arbitrary>], iteration_bounds = array<i64: 1>, scalar_prefetch = 0 : i64, scratch_operands = 0 : i64, tpu.core_type = #tpu.core_type<tc>, window_params = [{pipeline_mode = #tpu.pipeline_mode<synchronous>, transform_indices = @transform_0, window_bounds = array<i64: 16, 32>}, {pipeline_mode = #tpu.pipeline_mode<synchronous>, transform_indices = @transform_1, window_bounds = array<i64: 16, 32>}, {pipeline_mode = #tpu.pipeline_mode<synchronous>, transform_indices = @transform_2, window_bounds = array<i64: 32, 32>}, {pipeline_mode = #tpu.pipeline_mode<synchronous>, transform_indices = @transform_3, window_bounds = array<i64: 32, 32>}, {pipeline_mode = #tpu.pipeline_mode<synchronous>, transform_indices = @transform_4, window_bounds = array<i64: 32, 128>}, {pipeline_mode = #tpu.pipeline_mode<synchronous>, transform_indices = @transform_5, window_bounds = array<i64: 1, 128>}, {pipeline_mode = #tpu.pipeline_mode<synchronous>, transform_indices = @transform_6, window_bounds = array<i64: 32, 128>}, {pipeline_mode = #tpu.pipeline_mode<synchronous>, transform_indices = @transform_7, window_bounds = array<i64: 1, 128>}, {pipeline_mode = #tpu.pipeline_mode<synchronous>, transform_indices = @transform_8, window_bounds = array<i64: 32, 64>}, {pipeline_mode = #tpu.pipeline_mode<synchronous>, transform_indices = @transform_9, window_bounds = array<i64: 1, 64>}, {pipeline_mode = #tpu.pipeline_mode<synchronous>, transform_indices = @transform_10, window_bounds = array<i64: 64, 32>}, {pipeline_mode = #tpu.pipeline_mode<synchronous>, transform_indices = @transform_11, window_bounds = array<i64: 1, 32>}, {pipeline_mode = #tpu.pipeline_mode<synchronous>, transform_indices = @transform_12, window_bounds = array<i64: 3, 32>}, {pipeline_mode = #tpu.pipeline_mode<synchronous>, transform_indices = @transform_13, window_bounds = array<i64: 3, 32>}, {pipeline_mode = #tpu.pipeline_mode<synchronous>, transform_indices = @transform_14, window_bounds = array<i64: 16, 32>}, {pipeline_mode = #tpu.pipeline_mode<synchronous>, transform_indices = @transform_15, window_bounds = array<i64: 16, 16>}]} {
    %c0 = arith.constant 0 : index
    %c0_0 = arith.constant 0 : index
    %0 = vector.load %arg1[%c0, %c0_0] : memref<16x32xf32, #tpu.memory_space<vmem>>, vector<16x32xf32>
    %c0_1 = arith.constant 0 : index
    %c0_2 = arith.constant 0 : index
    %1 = vector.load %arg2[%c0_1, %c0_2] : memref<16x32xf32, #tpu.memory_space<vmem>>, vector<16x32xf32>
    %c0_3 = arith.constant 0 : index
    %c0_4 = arith.constant 0 : index
    %2 = vector.load %arg3[%c0_3, %c0_4] : memref<32x32xf32, #tpu.memory_space<vmem>>, vector<32x32xf32>
    %c0_5 = arith.constant 0 : index
    %c0_6 = arith.constant 0 : index
    %3 = vector.load %arg4[%c0_5, %c0_6] : memref<32x32xf32, #tpu.memory_space<vmem>>, vector<32x32xf32>
    %c0_7 = arith.constant 0 : index
    %c0_8 = arith.constant 0 : index
    %4 = vector.load %arg5[%c0_7, %c0_8] : memref<32x128xf32, #tpu.memory_space<vmem>>, vector<32x128xf32>
    %c0_9 = arith.constant 0 : index
    %c0_10 = arith.constant 0 : index
    %5 = vector.load %arg6[%c0_9, %c0_10] : memref<1x128xf32, #tpu.memory_space<vmem>>, vector<1x128xf32>
    %c0_11 = arith.constant 0 : index
    %c0_12 = arith.constant 0 : index
    %6 = vector.load %arg7[%c0_11, %c0_12] : memref<32x128xf32, #tpu.memory_space<vmem>>, vector<32x128xf32>
    %c0_13 = arith.constant 0 : index
    %c0_14 = arith.constant 0 : index
    %7 = vector.load %arg8[%c0_13, %c0_14] : memref<1x128xf32, #tpu.memory_space<vmem>>, vector<1x128xf32>
    %c0_15 = arith.constant 0 : index
    %c0_16 = arith.constant 0 : index
    %8 = vector.load %arg9[%c0_15, %c0_16] : memref<32x64xf32, #tpu.memory_space<vmem>>, vector<32x64xf32>
    %c0_17 = arith.constant 0 : index
    %c0_18 = arith.constant 0 : index
    %9 = vector.load %arg10[%c0_17, %c0_18] : memref<1x64xf32, #tpu.memory_space<vmem>>, vector<1x64xf32>
    %c0_19 = arith.constant 0 : index
    %c0_20 = arith.constant 0 : index
    %10 = vector.load %arg11[%c0_19, %c0_20] : memref<64x32xf32, #tpu.memory_space<vmem>>, vector<64x32xf32>
    %c0_21 = arith.constant 0 : index
    %c0_22 = arith.constant 0 : index
    %11 = vector.load %arg12[%c0_21, %c0_22] : memref<1x32xf32, #tpu.memory_space<vmem>>, vector<1x32xf32>
    %c0_23 = arith.constant 0 : index
    %c0_24 = arith.constant 0 : index
    %12 = vector.load %arg13[%c0_23, %c0_24] : memref<3x32xf32, #tpu.memory_space<vmem>>, vector<3x32xf32>
    %c0_25 = arith.constant 0 : index
    %c0_26 = arith.constant 0 : index
    %13 = vector.load %arg14[%c0_25, %c0_26] : memref<3x32xf32, #tpu.memory_space<vmem>>, vector<3x32xf32>
    %14 = vector.extract_strided_slice %12 {offsets = [0, 0], sizes = [1, 32], strides = [1, 1]} : vector<3x32xf32> to vector<1x32xf32>
    %15 = vector.extract_strided_slice %12 {offsets = [1, 0], sizes = [1, 32], strides = [1, 1]} : vector<3x32xf32> to vector<1x32xf32>
    %16 = vector.extract_strided_slice %12 {offsets = [2, 0], sizes = [1, 32], strides = [1, 1]} : vector<3x32xf32> to vector<1x32xf32>
    %17 = vector.extract_strided_slice %13 {offsets = [0, 0], sizes = [1, 32], strides = [1, 1]} : vector<3x32xf32> to vector<1x32xf32>
    %18 = vector.extract_strided_slice %13 {offsets = [1, 0], sizes = [1, 32], strides = [1, 1]} : vector<3x32xf32> to vector<1x32xf32>
    %19 = vector.extract_strided_slice %13 {offsets = [2, 0], sizes = [1, 32], strides = [1, 1]} : vector<3x32xf32> to vector<1x32xf32>
    %20 = arith.addf %0, %1 : vector<16x32xf32>
    %21 = vector.extract_strided_slice %4 {offsets = [0, 0], sizes = [32, 32], strides = [1, 1]} : vector<32x128xf32> to vector<32x32xf32>
    %cst = arith.constant dense<0.000000e+00> : vector<16x32xf32>
    %22 = tpu.matmul %20, %21, %cst {dimension_numbers = #tpu.dot_dimension_numbers<[1], [0], [0], [1], [0, 0, 1, 1], [], []>} : vector<16x32xf32>, vector<32x32xf32>, vector<16x32xf32> -> vector<16x32xf32>
    %23 = vector.extract_strided_slice %5 {offsets = [0, 0], sizes = [1, 32], strides = [1, 1]} : vector<1x128xf32> to vector<1x32xf32>
    %24 = vector.broadcast %23 : vector<1x32xf32> to vector<16x32xf32>
    %25 = arith.addf %22, %24 : vector<16x32xf32>
    %26 = vector.extract_strided_slice %4 {offsets = [0, 32], sizes = [32, 32], strides = [1, 1]} : vector<32x128xf32> to vector<32x32xf32>
    %cst_27 = arith.constant dense<0.000000e+00> : vector<16x32xf32>
    %27 = tpu.matmul %20, %26, %cst_27 {dimension_numbers = #tpu.dot_dimension_numbers<[1], [0], [0], [1], [0, 0, 1, 1], [], []>} : vector<16x32xf32>, vector<32x32xf32>, vector<16x32xf32> -> vector<16x32xf32>
    %28 = vector.extract_strided_slice %5 {offsets = [0, 32], sizes = [1, 32], strides = [1, 1]} : vector<1x128xf32> to vector<1x32xf32>
    %29 = vector.broadcast %28 : vector<1x32xf32> to vector<16x32xf32>
    %30 = arith.addf %27, %29 : vector<16x32xf32>
    %31 = vector.extract_strided_slice %4 {offsets = [0, 64], sizes = [32, 32], strides = [1, 1]} : vector<32x128xf32> to vector<32x32xf32>
    %cst_28 = arith.constant dense<0.000000e+00> : vector<16x32xf32>
    %32 = tpu.matmul %0, %31, %cst_28 {dimension_numbers = #tpu.dot_dimension_numbers<[1], [0], [0], [1], [0, 0, 1, 1], [], []>} : vector<16x32xf32>, vector<32x32xf32>, vector<16x32xf32> -> vector<16x32xf32>
    %33 = vector.extract_strided_slice %5 {offsets = [0, 64], sizes = [1, 32], strides = [1, 1]} : vector<1x128xf32> to vector<1x32xf32>
    %34 = vector.broadcast %33 : vector<1x32xf32> to vector<16x32xf32>
    %35 = arith.addf %32, %34 : vector<16x32xf32>
    %36 = vector.extract_strided_slice %4 {offsets = [0, 96], sizes = [32, 32], strides = [1, 1]} : vector<32x128xf32> to vector<32x32xf32>
    %37 = vector.extract_strided_slice %5 {offsets = [0, 96], sizes = [1, 32], strides = [1, 1]} : vector<1x128xf32> to vector<1x32xf32>
    %cst_29 = arith.constant 0.000000e+00 : f32
    %38 = vector.broadcast %cst_29 : f32 to vector<16x32xf32>
    %39 = vector.extract_strided_slice %25 {offsets = [0, 0], sizes = [8, 8], strides = [1, 1]} : vector<16x32xf32> to vector<8x8xf32>
    %40 = vector.extract_strided_slice %30 {offsets = [0, 0], sizes = [8, 8], strides = [1, 1]} : vector<16x32xf32> to vector<8x8xf32>
    %41 = vector.extract_strided_slice %35 {offsets = [0, 0], sizes = [8, 8], strides = [1, 1]} : vector<16x32xf32> to vector<8x8xf32>
    "tpu.trace_start"() <{level = 10 : i32, message = "qe,ke->qk"}> : () -> ()
    %cst_30 = arith.constant dense<0.000000e+00> : vector<8x8xf32>
    %42 = tpu.matmul %39, %40, %cst_30 {dimension_numbers = #tpu.dot_dimension_numbers<[1], [1], [0], [0], [0, 0, 1, 0], [], []>} : vector<8x8xf32>, vector<8x8xf32>, vector<8x8xf32> -> vector<8x8xf32>
    "tpu.trace_stop"() : () -> ()
    %cst_31 = arith.constant dense<0xFF800000> : vector<8xf32>
    %43 = vector.multi_reduction <maximumf>, %42, %cst_31 [1] : vector<8x8xf32> to vector<8xf32>
    %44 = vector.shape_cast %43 : vector<8xf32> to vector<8x1xf32>
    %45 = vector.broadcast %44 : vector<8x1xf32> to vector<8x8xf32>
    %46 = arith.subf %42, %45 : vector<8x8xf32>
    %47 = math.exp %46 : vector<8x8xf32>
    %cst_32 = arith.constant dense<0.000000e+00> : vector<8xf32>
    %48 = vector.multi_reduction <add>, %47, %cst_32 [1] : vector<8x8xf32> to vector<8xf32>
    %49 = vector.shape_cast %48 : vector<8xf32> to vector<8x1xf32>
    %50 = vector.broadcast %49 : vector<8x1xf32> to vector<8x8xf32>
    %51 = arith.divf %47, %50 : vector<8x8xf32>
    %cst_33 = arith.constant dense<0.000000e+00> : vector<8x8xf32>
    %52 = tpu.matmul %51, %41, %cst_33 {dimension_numbers = #tpu.dot_dimension_numbers<[1], [0], [0], [1], [0, 0, 1, 1], [], []>} : vector<8x8xf32>, vector<8x8xf32>, vector<8x8xf32> -> vector<8x8xf32>
    %53 = vector.extract_strided_slice %25 {offsets = [8, 0], sizes = [8, 8], strides = [1, 1]} : vector<16x32xf32> to vector<8x8xf32>
    %54 = vector.extract_strided_slice %30 {offsets = [8, 0], sizes = [8, 8], strides = [1, 1]} : vector<16x32xf32> to vector<8x8xf32>
    %55 = vector.extract_strided_slice %35 {offsets = [8, 0], sizes = [8, 8], strides = [1, 1]} : vector<16x32xf32> to vector<8x8xf32>
    "tpu.trace_start"() <{level = 10 : i32, message = "qe,ke->qk"}> : () -> ()
    %cst_34 = arith.constant dense<0.000000e+00> : vector<8x8xf32>
    %56 = tpu.matmul %53, %54, %cst_34 {dimension_numbers = #tpu.dot_dimension_numbers<[1], [1], [0], [0], [0, 0, 1, 0], [], []>} : vector<8x8xf32>, vector<8x8xf32>, vector<8x8xf32> -> vector<8x8xf32>
    "tpu.trace_stop"() : () -> ()
    %cst_35 = arith.constant dense<0xFF800000> : vector<8xf32>
    %57 = vector.multi_reduction <maximumf>, %56, %cst_35 [1] : vector<8x8xf32> to vector<8xf32>
    %58 = vector.shape_cast %57 : vector<8xf32> to vector<8x1xf32>
    %59 = vector.broadcast %58 : vector<8x1xf32> to vector<8x8xf32>
    %60 = arith.subf %56, %59 : vector<8x8xf32>
    %61 = math.exp %60 : vector<8x8xf32>
    %cst_36 = arith.constant dense<0.000000e+00> : vector<8xf32>
    %62 = vector.multi_reduction <add>, %61, %cst_36 [1] : vector<8x8xf32> to vector<8xf32>
    %63 = vector.shape_cast %62 : vector<8xf32> to vector<8x1xf32>
    %64 = vector.broadcast %63 : vector<8x1xf32> to vector<8x8xf32>
    %65 = arith.divf %61, %64 : vector<8x8xf32>
    %cst_37 = arith.constant dense<0.000000e+00> : vector<8x8xf32>
    %66 = tpu.matmul %65, %55, %cst_37 {dimension_numbers = #tpu.dot_dimension_numbers<[1], [0], [0], [1], [0, 0, 1, 1], [], []>} : vector<8x8xf32>, vector<8x8xf32>, vector<8x8xf32> -> vector<8x8xf32>
    %67 = tpu.concatenate %52, %66 in 0 : vector<8x8xf32>, vector<8x8xf32> -> vector<16x8xf32>
    %68 = vector.extract_strided_slice %36 {offsets = [0, 0], sizes = [8, 32], strides = [1, 1]} : vector<32x32xf32> to vector<8x32xf32>
    %cst_38 = arith.constant dense<0.000000e+00> : vector<16x32xf32>
    %69 = tpu.matmul %67, %68, %cst_38 {dimension_numbers = #tpu.dot_dimension_numbers<[1], [0], [0], [1], [0, 0, 1, 1], [], []>} : vector<16x8xf32>, vector<8x32xf32>, vector<16x32xf32> -> vector<16x32xf32>
    %70 = arith.addf %38, %69 : vector<16x32xf32>
    %71 = vector.extract_strided_slice %25 {offsets = [0, 8], sizes = [8, 8], strides = [1, 1]} : vector<16x32xf32> to vector<8x8xf32>
    %72 = vector.extract_strided_slice %30 {offsets = [0, 8], sizes = [8, 8], strides = [1, 1]} : vector<16x32xf32> to vector<8x8xf32>
    %73 = vector.extract_strided_slice %35 {offsets = [0, 8], sizes = [8, 8], strides = [1, 1]} : vector<16x32xf32> to vector<8x8xf32>
    "tpu.trace_start"() <{level = 10 : i32, message = "qe,ke->qk"}> : () -> ()
    %cst_39 = arith.constant dense<0.000000e+00> : vector<8x8xf32>
    %74 = tpu.matmul %71, %72, %cst_39 {dimension_numbers = #tpu.dot_dimension_numbers<[1], [1], [0], [0], [0, 0, 1, 0], [], []>} : vector<8x8xf32>, vector<8x8xf32>, vector<8x8xf32> -> vector<8x8xf32>
    "tpu.trace_stop"() : () -> ()
    %cst_40 = arith.constant dense<0xFF800000> : vector<8xf32>
    %75 = vector.multi_reduction <maximumf>, %74, %cst_40 [1] : vector<8x8xf32> to vector<8xf32>
    %76 = vector.shape_cast %75 : vector<8xf32> to vector<8x1xf32>
    %77 = vector.broadcast %76 : vector<8x1xf32> to vector<8x8xf32>
    %78 = arith.subf %74, %77 : vector<8x8xf32>
    %79 = math.exp %78 : vector<8x8xf32>
    %cst_41 = arith.constant dense<0.000000e+00> : vector<8xf32>
    %80 = vector.multi_reduction <add>, %79, %cst_41 [1] : vector<8x8xf32> to vector<8xf32>
    %81 = vector.shape_cast %80 : vector<8xf32> to vector<8x1xf32>
    %82 = vector.broadcast %81 : vector<8x1xf32> to vector<8x8xf32>
    %83 = arith.divf %79, %82 : vector<8x8xf32>
    %cst_42 = arith.constant dense<0.000000e+00> : vector<8x8xf32>
    %84 = tpu.matmul %83, %73, %cst_42 {dimension_numbers = #tpu.dot_dimension_numbers<[1], [0], [0], [1], [0, 0, 1, 1], [], []>} : vector<8x8xf32>, vector<8x8xf32>, vector<8x8xf32> -> vector<8x8xf32>
    %85 = vector.extract_strided_slice %25 {offsets = [8, 8], sizes = [8, 8], strides = [1, 1]} : vector<16x32xf32> to vector<8x8xf32>
    %86 = vector.extract_strided_slice %30 {offsets = [8, 8], sizes = [8, 8], strides = [1, 1]} : vector<16x32xf32> to vector<8x8xf32>
    %87 = vector.extract_strided_slice %35 {offsets = [8, 8], sizes = [8, 8], strides = [1, 1]} : vector<16x32xf32> to vector<8x8xf32>
    "tpu.trace_start"() <{level = 10 : i32, message = "qe,ke->qk"}> : () -> ()
    %cst_43 = arith.constant dense<0.000000e+00> : vector<8x8xf32>
    %88 = tpu.matmul %85, %86, %cst_43 {dimension_numbers = #tpu.dot_dimension_numbers<[1], [1], [0], [0], [0, 0, 1, 0], [], []>} : vector<8x8xf32>, vector<8x8xf32>, vector<8x8xf32> -> vector<8x8xf32>
    "tpu.trace_stop"() : () -> ()
    %cst_44 = arith.constant dense<0xFF800000> : vector<8xf32>
    %89 = vector.multi_reduction <maximumf>, %88, %cst_44 [1] : vector<8x8xf32> to vector<8xf32>
    %90 = vector.shape_cast %89 : vector<8xf32> to vector<8x1xf32>
    %91 = vector.broadcast %90 : vector<8x1xf32> to vector<8x8xf32>
    %92 = arith.subf %88, %91 : vector<8x8xf32>
    %93 = math.exp %92 : vector<8x8xf32>
    %cst_45 = arith.constant dense<0.000000e+00> : vector<8xf32>
    %94 = vector.multi_reduction <add>, %93, %cst_45 [1] : vector<8x8xf32> to vector<8xf32>
    %95 = vector.shape_cast %94 : vector<8xf32> to vector<8x1xf32>
    %96 = vector.broadcast %95 : vector<8x1xf32> to vector<8x8xf32>
    %97 = arith.divf %93, %96 : vector<8x8xf32>
    %cst_46 = arith.constant dense<0.000000e+00> : vector<8x8xf32>
    %98 = tpu.matmul %97, %87, %cst_46 {dimension_numbers = #tpu.dot_dimension_numbers<[1], [0], [0], [1], [0, 0, 1, 1], [], []>} : vector<8x8xf32>, vector<8x8xf32>, vector<8x8xf32> -> vector<8x8xf32>
    %99 = tpu.concatenate %84, %98 in 0 : vector<8x8xf32>, vector<8x8xf32> -> vector<16x8xf32>
    %100 = vector.extract_strided_slice %36 {offsets = [8, 0], sizes = [8, 32], strides = [1, 1]} : vector<32x32xf32> to vector<8x32xf32>
    %cst_47 = arith.constant dense<0.000000e+00> : vector<16x32xf32>
    %101 = tpu.matmul %99, %100, %cst_47 {dimension_numbers = #tpu.dot_dimension_numbers<[1], [0], [0], [1], [0, 0, 1, 1], [], []>} : vector<16x8xf32>, vector<8x32xf32>, vector<16x32xf32> -> vector<16x32xf32>
    %102 = arith.addf %70, %101 : vector<16x32xf32>
    %103 = vector.extract_strided_slice %25 {offsets = [0, 16], sizes = [8, 8], strides = [1, 1]} : vector<16x32xf32> to vector<8x8xf32>
    %104 = vector.extract_strided_slice %30 {offsets = [0, 16], sizes = [8, 8], strides = [1, 1]} : vector<16x32xf32> to vector<8x8xf32>
    %105 = vector.extract_strided_slice %35 {offsets = [0, 16], sizes = [8, 8], strides = [1, 1]} : vector<16x32xf32> to vector<8x8xf32>
    "tpu.trace_start"() <{level = 10 : i32, message = "qe,ke->qk"}> : () -> ()
    %cst_48 = arith.constant dense<0.000000e+00> : vector<8x8xf32>
    %106 = tpu.matmul %103, %104, %cst_48 {dimension_numbers = #tpu.dot_dimension_numbers<[1], [1], [0], [0], [0, 0, 1, 0], [], []>} : vector<8x8xf32>, vector<8x8xf32>, vector<8x8xf32> -> vector<8x8xf32>
    "tpu.trace_stop"() : () -> ()
    %cst_49 = arith.constant dense<0xFF800000> : vector<8xf32>
    %107 = vector.multi_reduction <maximumf>, %106, %cst_49 [1] : vector<8x8xf32> to vector<8xf32>
    %108 = vector.shape_cast %107 : vector<8xf32> to vector<8x1xf32>
    %109 = vector.broadcast %108 : vector<8x1xf32> to vector<8x8xf32>
    %110 = arith.subf %106, %109 : vector<8x8xf32>
    %111 = math.exp %110 : vector<8x8xf32>
    %cst_50 = arith.constant dense<0.000000e+00> : vector<8xf32>
    %112 = vector.multi_reduction <add>, %111, %cst_50 [1] : vector<8x8xf32> to vector<8xf32>
    %113 = vector.shape_cast %112 : vector<8xf32> to vector<8x1xf32>
    %114 = vector.broadcast %113 : vector<8x1xf32> to vector<8x8xf32>
    %115 = arith.divf %111, %114 : vector<8x8xf32>
    %cst_51 = arith.constant dense<0.000000e+00> : vector<8x8xf32>
    %116 = tpu.matmul %115, %105, %cst_51 {dimension_numbers = #tpu.dot_dimension_numbers<[1], [0], [0], [1], [0, 0, 1, 1], [], []>} : vector<8x8xf32>, vector<8x8xf32>, vector<8x8xf32> -> vector<8x8xf32>
    %117 = vector.extract_strided_slice %25 {offsets = [8, 16], sizes = [8, 8], strides = [1, 1]} : vector<16x32xf32> to vector<8x8xf32>
    %118 = vector.extract_strided_slice %30 {offsets = [8, 16], sizes = [8, 8], strides = [1, 1]} : vector<16x32xf32> to vector<8x8xf32>
    %119 = vector.extract_strided_slice %35 {offsets = [8, 16], sizes = [8, 8], strides = [1, 1]} : vector<16x32xf32> to vector<8x8xf32>
    "tpu.trace_start"() <{level = 10 : i32, message = "qe,ke->qk"}> : () -> ()
    %cst_52 = arith.constant dense<0.000000e+00> : vector<8x8xf32>
    %120 = tpu.matmul %117, %118, %cst_52 {dimension_numbers = #tpu.dot_dimension_numbers<[1], [1], [0], [0], [0, 0, 1, 0], [], []>} : vector<8x8xf32>, vector<8x8xf32>, vector<8x8xf32> -> vector<8x8xf32>
    "tpu.trace_stop"() : () -> ()
    %cst_53 = arith.constant dense<0xFF800000> : vector<8xf32>
    %121 = vector.multi_reduction <maximumf>, %120, %cst_53 [1] : vector<8x8xf32> to vector<8xf32>
    %122 = vector.shape_cast %121 : vector<8xf32> to vector<8x1xf32>
    %123 = vector.broadcast %122 : vector<8x1xf32> to vector<8x8xf32>
    %124 = arith.subf %120, %123 : vector<8x8xf32>
    %125 = math.exp %124 : vector<8x8xf32>
    %cst_54 = arith.constant dense<0.000000e+00> : vector<8xf32>
    %126 = vector.multi_reduction <add>, %125, %cst_54 [1] : vector<8x8xf32> to vector<8xf32>
    %127 = vector.shape_cast %126 : vector<8xf32> to vector<8x1xf32>
    %128 = vector.broadcast %127 : vector<8x1xf32> to vector<8x8xf32>
    %129 = arith.divf %125, %128 : vector<8x8xf32>
    %cst_55 = arith.constant dense<0.000000e+00> : vector<8x8xf32>
    %130 = tpu.matmul %129, %119, %cst_55 {dimension_numbers = #tpu.dot_dimension_numbers<[1], [0], [0], [1], [0, 0, 1, 1], [], []>} : vector<8x8xf32>, vector<8x8xf32>, vector<8x8xf32> -> vector<8x8xf32>
    %131 = tpu.concatenate %116, %130 in 0 : vector<8x8xf32>, vector<8x8xf32> -> vector<16x8xf32>
    %132 = vector.extract_strided_slice %36 {offsets = [16, 0], sizes = [8, 32], strides = [1, 1]} : vector<32x32xf32> to vector<8x32xf32>
    %cst_56 = arith.constant dense<0.000000e+00> : vector<16x32xf32>
    %133 = tpu.matmul %131, %132, %cst_56 {dimension_numbers = #tpu.dot_dimension_numbers<[1], [0], [0], [1], [0, 0, 1, 1], [], []>} : vector<16x8xf32>, vector<8x32xf32>, vector<16x32xf32> -> vector<16x32xf32>
    %134 = arith.addf %102, %133 : vector<16x32xf32>
    %135 = vector.extract_strided_slice %25 {offsets = [0, 24], sizes = [8, 8], strides = [1, 1]} : vector<16x32xf32> to vector<8x8xf32>
    %136 = vector.extract_strided_slice %30 {offsets = [0, 24], sizes = [8, 8], strides = [1, 1]} : vector<16x32xf32> to vector<8x8xf32>
    %137 = vector.extract_strided_slice %35 {offsets = [0, 24], sizes = [8, 8], strides = [1, 1]} : vector<16x32xf32> to vector<8x8xf32>
    "tpu.trace_start"() <{level = 10 : i32, message = "qe,ke->qk"}> : () -> ()
    %cst_57 = arith.constant dense<0.000000e+00> : vector<8x8xf32>
    %138 = tpu.matmul %135, %136, %cst_57 {dimension_numbers = #tpu.dot_dimension_numbers<[1], [1], [0], [0], [0, 0, 1, 0], [], []>} : vector<8x8xf32>, vector<8x8xf32>, vector<8x8xf32> -> vector<8x8xf32>
    "tpu.trace_stop"() : () -> ()
    %cst_58 = arith.constant dense<0xFF800000> : vector<8xf32>
    %139 = vector.multi_reduction <maximumf>, %138, %cst_58 [1] : vector<8x8xf32> to vector<8xf32>
    %140 = vector.shape_cast %139 : vector<8xf32> to vector<8x1xf32>
    %141 = vector.broadcast %140 : vector<8x1xf32> to vector<8x8xf32>
    %142 = arith.subf %138, %141 : vector<8x8xf32>
    %143 = math.exp %142 : vector<8x8xf32>
    %cst_59 = arith.constant dense<0.000000e+00> : vector<8xf32>
    %144 = vector.multi_reduction <add>, %143, %cst_59 [1] : vector<8x8xf32> to vector<8xf32>
    %145 = vector.shape_cast %144 : vector<8xf32> to vector<8x1xf32>
    %146 = vector.broadcast %145 : vector<8x1xf32> to vector<8x8xf32>
    %147 = arith.divf %143, %146 : vector<8x8xf32>
    %cst_60 = arith.constant dense<0.000000e+00> : vector<8x8xf32>
    %148 = tpu.matmul %147, %137, %cst_60 {dimension_numbers = #tpu.dot_dimension_numbers<[1], [0], [0], [1], [0, 0, 1, 1], [], []>} : vector<8x8xf32>, vector<8x8xf32>, vector<8x8xf32> -> vector<8x8xf32>
    %149 = vector.extract_strided_slice %25 {offsets = [8, 24], sizes = [8, 8], strides = [1, 1]} : vector<16x32xf32> to vector<8x8xf32>
    %150 = vector.extract_strided_slice %30 {offsets = [8, 24], sizes = [8, 8], strides = [1, 1]} : vector<16x32xf32> to vector<8x8xf32>
    %151 = vector.extract_strided_slice %35 {offsets = [8, 24], sizes = [8, 8], strides = [1, 1]} : vector<16x32xf32> to vector<8x8xf32>
    "tpu.trace_start"() <{level = 10 : i32, message = "qe,ke->qk"}> : () -> ()
    %cst_61 = arith.constant dense<0.000000e+00> : vector<8x8xf32>
    %152 = tpu.matmul %149, %150, %cst_61 {dimension_numbers = #tpu.dot_dimension_numbers<[1], [1], [0], [0], [0, 0, 1, 0], [], []>} : vector<8x8xf32>, vector<8x8xf32>, vector<8x8xf32> -> vector<8x8xf32>
    "tpu.trace_stop"() : () -> ()
    %cst_62 = arith.constant dense<0xFF800000> : vector<8xf32>
    %153 = vector.multi_reduction <maximumf>, %152, %cst_62 [1] : vector<8x8xf32> to vector<8xf32>
    %154 = vector.shape_cast %153 : vector<8xf32> to vector<8x1xf32>
    %155 = vector.broadcast %154 : vector<8x1xf32> to vector<8x8xf32>
    %156 = arith.subf %152, %155 : vector<8x8xf32>
    %157 = math.exp %156 : vector<8x8xf32>
    %cst_63 = arith.constant dense<0.000000e+00> : vector<8xf32>
    %158 = vector.multi_reduction <add>, %157, %cst_63 [1] : vector<8x8xf32> to vector<8xf32>
    %159 = vector.shape_cast %158 : vector<8xf32> to vector<8x1xf32>
    %160 = vector.broadcast %159 : vector<8x1xf32> to vector<8x8xf32>
    %161 = arith.divf %157, %160 : vector<8x8xf32>
    %cst_64 = arith.constant dense<0.000000e+00> : vector<8x8xf32>
    %162 = tpu.matmul %161, %151, %cst_64 {dimension_numbers = #tpu.dot_dimension_numbers<[1], [0], [0], [1], [0, 0, 1, 1], [], []>} : vector<8x8xf32>, vector<8x8xf32>, vector<8x8xf32> -> vector<8x8xf32>
    %163 = tpu.concatenate %148, %162 in 0 : vector<8x8xf32>, vector<8x8xf32> -> vector<16x8xf32>
    %164 = vector.extract_strided_slice %36 {offsets = [24, 0], sizes = [8, 32], strides = [1, 1]} : vector<32x32xf32> to vector<8x32xf32>
    %cst_65 = arith.constant dense<0.000000e+00> : vector<16x32xf32>
    %165 = tpu.matmul %163, %164, %cst_65 {dimension_numbers = #tpu.dot_dimension_numbers<[1], [0], [0], [1], [0, 0, 1, 1], [], []>} : vector<16x8xf32>, vector<8x32xf32>, vector<16x32xf32> -> vector<16x32xf32>
    %166 = arith.addf %134, %165 : vector<16x32xf32>
    %167 = vector.broadcast %37 : vector<1x32xf32> to vector<16x32xf32>
    %168 = arith.addf %166, %167 : vector<16x32xf32>
    %169 = arith.addf %0, %168 : vector<16x32xf32>
    %cst_66 = arith.constant dense<0.000000e+00> : vector<16xf32>
    %170 = vector.multi_reduction <add>, %169, %cst_66 [1] : vector<16x32xf32> to vector<16xf32>
    %171 = vector.shape_cast %170 : vector<16xf32> to vector<16x1xf32>
    %cst_67 = arith.constant 3.200000e+01 : f32
    %172 = vector.broadcast %cst_67 : f32 to vector<16x1xf32>
    %173 = arith.divf %171, %172 : vector<16x1xf32>
    %174 = vector.broadcast %173 : vector<16x1xf32> to vector<16x32xf32>
    %175 = arith.subf %169, %174 : vector<16x32xf32>
    %176 = arith.mulf %175, %175 : vector<16x32xf32>
    %cst_68 = arith.constant dense<0.000000e+00> : vector<16xf32>
    %177 = vector.multi_reduction <add>, %176, %cst_68 [1] : vector<16x32xf32> to vector<16xf32>
    %178 = vector.shape_cast %177 : vector<16xf32> to vector<16x1xf32>
    %cst_69 = arith.constant 3.200000e+01 : f32
    %179 = vector.broadcast %cst_69 : f32 to vector<16x1xf32>
    %180 = arith.divf %178, %179 : vector<16x1xf32>
    %181 = vector.broadcast %173 : vector<16x1xf32> to vector<16x32xf32>
    %182 = arith.subf %169, %181 : vector<16x32xf32>
    %cst_70 = arith.constant 9.99999974E-6 : f32
    %183 = vector.broadcast %cst_70 : f32 to vector<16x1xf32>
    %184 = arith.addf %180, %183 : vector<16x1xf32>
    %185 = math.rsqrt %184 : vector<16x1xf32>
    %186 = vector.broadcast %185 : vector<16x1xf32> to vector<16x32xf32>
    %187 = arith.mulf %182, %186 : vector<16x32xf32>
    %188 = vector.broadcast %14 : vector<1x32xf32> to vector<16x32xf32>
    %189 = arith.mulf %187, %188 : vector<16x32xf32>
    %190 = vector.broadcast %17 : vector<1x32xf32> to vector<16x32xf32>
    %191 = arith.addf %189, %190 : vector<16x32xf32>
    %192 = arith.addf %191, %1 : vector<16x32xf32>
    %193 = arith.addf %2, %3 : vector<32x32xf32>
    %194 = vector.extract_strided_slice %6 {offsets = [0, 0], sizes = [32, 32], strides = [1, 1]} : vector<32x128xf32> to vector<32x32xf32>
    %cst_71 = arith.constant dense<0.000000e+00> : vector<16x32xf32>
    %195 = tpu.matmul %192, %194, %cst_71 {dimension_numbers = #tpu.dot_dimension_numbers<[1], [0], [0], [1], [0, 0, 1, 1], [], []>} : vector<16x32xf32>, vector<32x32xf32>, vector<16x32xf32> -> vector<16x32xf32>
    %196 = vector.extract_strided_slice %7 {offsets = [0, 0], sizes = [1, 32], strides = [1, 1]} : vector<1x128xf32> to vector<1x32xf32>
    %197 = vector.broadcast %196 : vector<1x32xf32> to vector<16x32xf32>
    %198 = arith.addf %195, %197 : vector<16x32xf32>
    %199 = vector.extract_strided_slice %6 {offsets = [0, 32], sizes = [32, 32], strides = [1, 1]} : vector<32x128xf32> to vector<32x32xf32>
    %cst_72 = arith.constant dense<0.000000e+00> : vector<32x32xf32>
    %200 = tpu.matmul %193, %199, %cst_72 {dimension_numbers = #tpu.dot_dimension_numbers<[1], [0], [0], [1], [0, 0, 1, 1], [], []>} : vector<32x32xf32>, vector<32x32xf32>, vector<32x32xf32> -> vector<32x32xf32>
    %201 = vector.extract_strided_slice %7 {offsets = [0, 32], sizes = [1, 32], strides = [1, 1]} : vector<1x128xf32> to vector<1x32xf32>
    %202 = vector.broadcast %201 : vector<1x32xf32> to vector<32x32xf32>
    %203 = arith.addf %200, %202 : vector<32x32xf32>
    %204 = vector.extract_strided_slice %6 {offsets = [0, 64], sizes = [32, 32], strides = [1, 1]} : vector<32x128xf32> to vector<32x32xf32>
    %cst_73 = arith.constant dense<0.000000e+00> : vector<32x32xf32>
    %205 = tpu.matmul %2, %204, %cst_73 {dimension_numbers = #tpu.dot_dimension_numbers<[1], [0], [0], [1], [0, 0, 1, 1], [], []>} : vector<32x32xf32>, vector<32x32xf32>, vector<32x32xf32> -> vector<32x32xf32>
    %206 = vector.extract_strided_slice %7 {offsets = [0, 64], sizes = [1, 32], strides = [1, 1]} : vector<1x128xf32> to vector<1x32xf32>
    %207 = vector.broadcast %206 : vector<1x32xf32> to vector<32x32xf32>
    %208 = arith.addf %205, %207 : vector<32x32xf32>
    %209 = vector.extract_strided_slice %6 {offsets = [0, 96], sizes = [32, 32], strides = [1, 1]} : vector<32x128xf32> to vector<32x32xf32>
    %210 = vector.extract_strided_slice %7 {offsets = [0, 96], sizes = [1, 32], strides = [1, 1]} : vector<1x128xf32> to vector<1x32xf32>
    %cst_74 = arith.constant 0.000000e+00 : f32
    %211 = vector.broadcast %cst_74 : f32 to vector<16x32xf32>
    %cst_75 = arith.constant 0.000000e+00 : f32
    %212 = vector.broadcast %cst_75 : f32 to vector<8x16xf32>
    %cst_76 = arith.constant 0.000000e+00 : f32
    %213 = vector.broadcast %cst_76 : f32 to vector<8x16xf32>
    %214 = vector.extract_strided_slice %198 {offsets = [0, 0], sizes = [8, 8], strides = [1, 1]} : vector<16x32xf32> to vector<8x8xf32>
    %215 = vector.extract_strided_slice %203 {offsets = [0, 0], sizes = [16, 8], strides = [1, 1]} : vector<32x32xf32> to vector<16x8xf32>
    %216 = vector.extract_strided_slice %208 {offsets = [0, 0], sizes = [16, 8], strides = [1, 1]} : vector<32x32xf32> to vector<16x8xf32>
    "tpu.trace_start"() <{level = 10 : i32, message = "qe,ke->qk"}> : () -> ()
    %cst_77 = arith.constant dense<0.000000e+00> : vector<8x16xf32>
    %217 = tpu.matmul %214, %215, %cst_77 {dimension_numbers = #tpu.dot_dimension_numbers<[1], [1], [0], [0], [0, 0, 1, 0], [], []>} : vector<8x8xf32>, vector<16x8xf32>, vector<8x16xf32> -> vector<8x16xf32>
    "tpu.trace_stop"() : () -> ()
    %cst_78 = arith.constant dense<0xFF800000> : vector<8xf32>
    %218 = vector.multi_reduction <maximumf>, %217, %cst_78 [1] : vector<8x16xf32> to vector<8xf32>
    %219 = vector.shape_cast %218 : vector<8xf32> to vector<8x1xf32>
    %220 = vector.broadcast %219 : vector<8x1xf32> to vector<8x16xf32>
    %221 = arith.subf %217, %220 : vector<8x16xf32>
    %222 = math.exp %221 : vector<8x16xf32>
    %cst_79 = arith.constant dense<0.000000e+00> : vector<8xf32>
    %223 = vector.multi_reduction <add>, %222, %cst_79 [1] : vector<8x16xf32> to vector<8xf32>
    %224 = vector.shape_cast %223 : vector<8xf32> to vector<8x1xf32>
    %225 = vector.broadcast %224 : vector<8x1xf32> to vector<8x16xf32>
    %226 = arith.divf %222, %225 : vector<8x16xf32>
    %227 = arith.addf %212, %226 : vector<8x16xf32>
    %cst_80 = arith.constant dense<0.000000e+00> : vector<8x8xf32>
    %228 = tpu.matmul %226, %216, %cst_80 {dimension_numbers = #tpu.dot_dimension_numbers<[1], [0], [0], [1], [0, 0, 1, 1], [], []>} : vector<8x16xf32>, vector<16x8xf32>, vector<8x8xf32> -> vector<8x8xf32>
    %229 = vector.extract_strided_slice %198 {offsets = [8, 0], sizes = [8, 8], strides = [1, 1]} : vector<16x32xf32> to vector<8x8xf32>
    %230 = vector.extract_strided_slice %203 {offsets = [16, 0], sizes = [16, 8], strides = [1, 1]} : vector<32x32xf32> to vector<16x8xf32>
    %231 = vector.extract_strided_slice %208 {offsets = [16, 0], sizes = [16, 8], strides = [1, 1]} : vector<32x32xf32> to vector<16x8xf32>
    "tpu.trace_start"() <{level = 10 : i32, message = "qe,ke->qk"}> : () -> ()
    %cst_81 = arith.constant dense<0.000000e+00> : vector<8x16xf32>
    %232 = tpu.matmul %229, %230, %cst_81 {dimension_numbers = #tpu.dot_dimension_numbers<[1], [1], [0], [0], [0, 0, 1, 0], [], []>} : vector<8x8xf32>, vector<16x8xf32>, vector<8x16xf32> -> vector<8x16xf32>
    "tpu.trace_stop"() : () -> ()
    %cst_82 = arith.constant dense<0xFF800000> : vector<8xf32>
    %233 = vector.multi_reduction <maximumf>, %232, %cst_82 [1] : vector<8x16xf32> to vector<8xf32>
    %234 = vector.shape_cast %233 : vector<8xf32> to vector<8x1xf32>
    %235 = vector.broadcast %234 : vector<8x1xf32> to vector<8x16xf32>
    %236 = arith.subf %232, %235 : vector<8x16xf32>
    %237 = math.exp %236 : vector<8x16xf32>
    %cst_83 = arith.constant dense<0.000000e+00> : vector<8xf32>
    %238 = vector.multi_reduction <add>, %237, %cst_83 [1] : vector<8x16xf32> to vector<8xf32>
    %239 = vector.shape_cast %238 : vector<8xf32> to vector<8x1xf32>
    %240 = vector.broadcast %239 : vector<8x1xf32> to vector<8x16xf32>
    %241 = arith.divf %237, %240 : vector<8x16xf32>
    %242 = arith.addf %213, %241 : vector<8x16xf32>
    %cst_84 = arith.constant dense<0.000000e+00> : vector<8x8xf32>
    %243 = tpu.matmul %241, %231, %cst_84 {dimension_numbers = #tpu.dot_dimension_numbers<[1], [0], [0], [1], [0, 0, 1, 1], [], []>} : vector<8x16xf32>, vector<16x8xf32>, vector<8x8xf32> -> vector<8x8xf32>
    %244 = tpu.concatenate %228, %243 in 0 : vector<8x8xf32>, vector<8x8xf32> -> vector<16x8xf32>
    %245 = vector.extract_strided_slice %209 {offsets = [0, 0], sizes = [8, 32], strides = [1, 1]} : vector<32x32xf32> to vector<8x32xf32>
    %cst_85 = arith.constant dense<0.000000e+00> : vector<16x32xf32>
    %246 = tpu.matmul %244, %245, %cst_85 {dimension_numbers = #tpu.dot_dimension_numbers<[1], [0], [0], [1], [0, 0, 1, 1], [], []>} : vector<16x8xf32>, vector<8x32xf32>, vector<16x32xf32> -> vector<16x32xf32>
    %247 = arith.addf %211, %246 : vector<16x32xf32>
    %248 = vector.extract_strided_slice %198 {offsets = [0, 8], sizes = [8, 8], strides = [1, 1]} : vector<16x32xf32> to vector<8x8xf32>
    %249 = vector.extract_strided_slice %203 {offsets = [0, 8], sizes = [16, 8], strides = [1, 1]} : vector<32x32xf32> to vector<16x8xf32>
    %250 = vector.extract_strided_slice %208 {offsets = [0, 8], sizes = [16, 8], strides = [1, 1]} : vector<32x32xf32> to vector<16x8xf32>
    "tpu.trace_start"() <{level = 10 : i32, message = "qe,ke->qk"}> : () -> ()
    %cst_86 = arith.constant dense<0.000000e+00> : vector<8x16xf32>
    %251 = tpu.matmul %248, %249, %cst_86 {dimension_numbers = #tpu.dot_dimension_numbers<[1], [1], [0], [0], [0, 0, 1, 0], [], []>} : vector<8x8xf32>, vector<16x8xf32>, vector<8x16xf32> -> vector<8x16xf32>
    "tpu.trace_stop"() : () -> ()
    %cst_87 = arith.constant dense<0xFF800000> : vector<8xf32>
    %252 = vector.multi_reduction <maximumf>, %251, %cst_87 [1] : vector<8x16xf32> to vector<8xf32>
    %253 = vector.shape_cast %252 : vector<8xf32> to vector<8x1xf32>
    %254 = vector.broadcast %253 : vector<8x1xf32> to vector<8x16xf32>
    %255 = arith.subf %251, %254 : vector<8x16xf32>
    %256 = math.exp %255 : vector<8x16xf32>
    %cst_88 = arith.constant dense<0.000000e+00> : vector<8xf32>
    %257 = vector.multi_reduction <add>, %256, %cst_88 [1] : vector<8x16xf32> to vector<8xf32>
    %258 = vector.shape_cast %257 : vector<8xf32> to vector<8x1xf32>
    %259 = vector.broadcast %258 : vector<8x1xf32> to vector<8x16xf32>
    %260 = arith.divf %256, %259 : vector<8x16xf32>
    %261 = arith.addf %227, %260 : vector<8x16xf32>
    %cst_89 = arith.constant dense<0.000000e+00> : vector<8x8xf32>
    %262 = tpu.matmul %260, %250, %cst_89 {dimension_numbers = #tpu.dot_dimension_numbers<[1], [0], [0], [1], [0, 0, 1, 1], [], []>} : vector<8x16xf32>, vector<16x8xf32>, vector<8x8xf32> -> vector<8x8xf32>
    %263 = vector.extract_strided_slice %198 {offsets = [8, 8], sizes = [8, 8], strides = [1, 1]} : vector<16x32xf32> to vector<8x8xf32>
    %264 = vector.extract_strided_slice %203 {offsets = [16, 8], sizes = [16, 8], strides = [1, 1]} : vector<32x32xf32> to vector<16x8xf32>
    %265 = vector.extract_strided_slice %208 {offsets = [16, 8], sizes = [16, 8], strides = [1, 1]} : vector<32x32xf32> to vector<16x8xf32>
    "tpu.trace_start"() <{level = 10 : i32, message = "qe,ke->qk"}> : () -> ()
    %cst_90 = arith.constant dense<0.000000e+00> : vector<8x16xf32>
    %266 = tpu.matmul %263, %264, %cst_90 {dimension_numbers = #tpu.dot_dimension_numbers<[1], [1], [0], [0], [0, 0, 1, 0], [], []>} : vector<8x8xf32>, vector<16x8xf32>, vector<8x16xf32> -> vector<8x16xf32>
    "tpu.trace_stop"() : () -> ()
    %cst_91 = arith.constant dense<0xFF800000> : vector<8xf32>
    %267 = vector.multi_reduction <maximumf>, %266, %cst_91 [1] : vector<8x16xf32> to vector<8xf32>
    %268 = vector.shape_cast %267 : vector<8xf32> to vector<8x1xf32>
    %269 = vector.broadcast %268 : vector<8x1xf32> to vector<8x16xf32>
    %270 = arith.subf %266, %269 : vector<8x16xf32>
    %271 = math.exp %270 : vector<8x16xf32>
    %cst_92 = arith.constant dense<0.000000e+00> : vector<8xf32>
    %272 = vector.multi_reduction <add>, %271, %cst_92 [1] : vector<8x16xf32> to vector<8xf32>
    %273 = vector.shape_cast %272 : vector<8xf32> to vector<8x1xf32>
    %274 = vector.broadcast %273 : vector<8x1xf32> to vector<8x16xf32>
    %275 = arith.divf %271, %274 : vector<8x16xf32>
    %276 = arith.addf %242, %275 : vector<8x16xf32>
    %cst_93 = arith.constant dense<0.000000e+00> : vector<8x8xf32>
    %277 = tpu.matmul %275, %265, %cst_93 {dimension_numbers = #tpu.dot_dimension_numbers<[1], [0], [0], [1], [0, 0, 1, 1], [], []>} : vector<8x16xf32>, vector<16x8xf32>, vector<8x8xf32> -> vector<8x8xf32>
    %278 = tpu.concatenate %262, %277 in 0 : vector<8x8xf32>, vector<8x8xf32> -> vector<16x8xf32>
    %279 = vector.extract_strided_slice %209 {offsets = [8, 0], sizes = [8, 32], strides = [1, 1]} : vector<32x32xf32> to vector<8x32xf32>
    %cst_94 = arith.constant dense<0.000000e+00> : vector<16x32xf32>
    %280 = tpu.matmul %278, %279, %cst_94 {dimension_numbers = #tpu.dot_dimension_numbers<[1], [0], [0], [1], [0, 0, 1, 1], [], []>} : vector<16x8xf32>, vector<8x32xf32>, vector<16x32xf32> -> vector<16x32xf32>
    %281 = arith.addf %247, %280 : vector<16x32xf32>
    %282 = vector.extract_strided_slice %198 {offsets = [0, 16], sizes = [8, 8], strides = [1, 1]} : vector<16x32xf32> to vector<8x8xf32>
    %283 = vector.extract_strided_slice %203 {offsets = [0, 16], sizes = [16, 8], strides = [1, 1]} : vector<32x32xf32> to vector<16x8xf32>
    %284 = vector.extract_strided_slice %208 {offsets = [0, 16], sizes = [16, 8], strides = [1, 1]} : vector<32x32xf32> to vector<16x8xf32>
    "tpu.trace_start"() <{level = 10 : i32, message = "qe,ke->qk"}> : () -> ()
    %cst_95 = arith.constant dense<0.000000e+00> : vector<8x16xf32>
    %285 = tpu.matmul %282, %283, %cst_95 {dimension_numbers = #tpu.dot_dimension_numbers<[1], [1], [0], [0], [0, 0, 1, 0], [], []>} : vector<8x8xf32>, vector<16x8xf32>, vector<8x16xf32> -> vector<8x16xf32>
    "tpu.trace_stop"() : () -> ()
    %cst_96 = arith.constant dense<0xFF800000> : vector<8xf32>
    %286 = vector.multi_reduction <maximumf>, %285, %cst_96 [1] : vector<8x16xf32> to vector<8xf32>
    %287 = vector.shape_cast %286 : vector<8xf32> to vector<8x1xf32>
    %288 = vector.broadcast %287 : vector<8x1xf32> to vector<8x16xf32>
    %289 = arith.subf %285, %288 : vector<8x16xf32>
    %290 = math.exp %289 : vector<8x16xf32>
    %cst_97 = arith.constant dense<0.000000e+00> : vector<8xf32>
    %291 = vector.multi_reduction <add>, %290, %cst_97 [1] : vector<8x16xf32> to vector<8xf32>
    %292 = vector.shape_cast %291 : vector<8xf32> to vector<8x1xf32>
    %293 = vector.broadcast %292 : vector<8x1xf32> to vector<8x16xf32>
    %294 = arith.divf %290, %293 : vector<8x16xf32>
    %295 = arith.addf %261, %294 : vector<8x16xf32>
    %cst_98 = arith.constant dense<0.000000e+00> : vector<8x8xf32>
    %296 = tpu.matmul %294, %284, %cst_98 {dimension_numbers = #tpu.dot_dimension_numbers<[1], [0], [0], [1], [0, 0, 1, 1], [], []>} : vector<8x16xf32>, vector<16x8xf32>, vector<8x8xf32> -> vector<8x8xf32>
    %297 = vector.extract_strided_slice %198 {offsets = [8, 16], sizes = [8, 8], strides = [1, 1]} : vector<16x32xf32> to vector<8x8xf32>
    %298 = vector.extract_strided_slice %203 {offsets = [16, 16], sizes = [16, 8], strides = [1, 1]} : vector<32x32xf32> to vector<16x8xf32>
    %299 = vector.extract_strided_slice %208 {offsets = [16, 16], sizes = [16, 8], strides = [1, 1]} : vector<32x32xf32> to vector<16x8xf32>
    "tpu.trace_start"() <{level = 10 : i32, message = "qe,ke->qk"}> : () -> ()
    %cst_99 = arith.constant dense<0.000000e+00> : vector<8x16xf32>
    %300 = tpu.matmul %297, %298, %cst_99 {dimension_numbers = #tpu.dot_dimension_numbers<[1], [1], [0], [0], [0, 0, 1, 0], [], []>} : vector<8x8xf32>, vector<16x8xf32>, vector<8x16xf32> -> vector<8x16xf32>
    "tpu.trace_stop"() : () -> ()
    %cst_100 = arith.constant dense<0xFF800000> : vector<8xf32>
    %301 = vector.multi_reduction <maximumf>, %300, %cst_100 [1] : vector<8x16xf32> to vector<8xf32>
    %302 = vector.shape_cast %301 : vector<8xf32> to vector<8x1xf32>
    %303 = vector.broadcast %302 : vector<8x1xf32> to vector<8x16xf32>
    %304 = arith.subf %300, %303 : vector<8x16xf32>
    %305 = math.exp %304 : vector<8x16xf32>
    %cst_101 = arith.constant dense<0.000000e+00> : vector<8xf32>
    %306 = vector.multi_reduction <add>, %305, %cst_101 [1] : vector<8x16xf32> to vector<8xf32>
    %307 = vector.shape_cast %306 : vector<8xf32> to vector<8x1xf32>
    %308 = vector.broadcast %307 : vector<8x1xf32> to vector<8x16xf32>
    %309 = arith.divf %305, %308 : vector<8x16xf32>
    %310 = arith.addf %276, %309 : vector<8x16xf32>
    %cst_102 = arith.constant dense<0.000000e+00> : vector<8x8xf32>
    %311 = tpu.matmul %309, %299, %cst_102 {dimension_numbers = #tpu.dot_dimension_numbers<[1], [0], [0], [1], [0, 0, 1, 1], [], []>} : vector<8x16xf32>, vector<16x8xf32>, vector<8x8xf32> -> vector<8x8xf32>
    %312 = tpu.concatenate %296, %311 in 0 : vector<8x8xf32>, vector<8x8xf32> -> vector<16x8xf32>
    %313 = vector.extract_strided_slice %209 {offsets = [16, 0], sizes = [8, 32], strides = [1, 1]} : vector<32x32xf32> to vector<8x32xf32>
    %cst_103 = arith.constant dense<0.000000e+00> : vector<16x32xf32>
    %314 = tpu.matmul %312, %313, %cst_103 {dimension_numbers = #tpu.dot_dimension_numbers<[1], [0], [0], [1], [0, 0, 1, 1], [], []>} : vector<16x8xf32>, vector<8x32xf32>, vector<16x32xf32> -> vector<16x32xf32>
    %315 = arith.addf %281, %314 : vector<16x32xf32>
    %316 = vector.extract_strided_slice %198 {offsets = [0, 24], sizes = [8, 8], strides = [1, 1]} : vector<16x32xf32> to vector<8x8xf32>
    %317 = vector.extract_strided_slice %203 {offsets = [0, 24], sizes = [16, 8], strides = [1, 1]} : vector<32x32xf32> to vector<16x8xf32>
    %318 = vector.extract_strided_slice %208 {offsets = [0, 24], sizes = [16, 8], strides = [1, 1]} : vector<32x32xf32> to vector<16x8xf32>
    "tpu.trace_start"() <{level = 10 : i32, message = "qe,ke->qk"}> : () -> ()
    %cst_104 = arith.constant dense<0.000000e+00> : vector<8x16xf32>
    %319 = tpu.matmul %316, %317, %cst_104 {dimension_numbers = #tpu.dot_dimension_numbers<[1], [1], [0], [0], [0, 0, 1, 0], [], []>} : vector<8x8xf32>, vector<16x8xf32>, vector<8x16xf32> -> vector<8x16xf32>
    "tpu.trace_stop"() : () -> ()
    %cst_105 = arith.constant dense<0xFF800000> : vector<8xf32>
    %320 = vector.multi_reduction <maximumf>, %319, %cst_105 [1] : vector<8x16xf32> to vector<8xf32>
    %321 = vector.shape_cast %320 : vector<8xf32> to vector<8x1xf32>
    %322 = vector.broadcast %321 : vector<8x1xf32> to vector<8x16xf32>
    %323 = arith.subf %319, %322 : vector<8x16xf32>
    %324 = math.exp %323 : vector<8x16xf32>
    %cst_106 = arith.constant dense<0.000000e+00> : vector<8xf32>
    %325 = vector.multi_reduction <add>, %324, %cst_106 [1] : vector<8x16xf32> to vector<8xf32>
    %326 = vector.shape_cast %325 : vector<8xf32> to vector<8x1xf32>
    %327 = vector.broadcast %326 : vector<8x1xf32> to vector<8x16xf32>
    %328 = arith.divf %324, %327 : vector<8x16xf32>
    %329 = arith.addf %295, %328 : vector<8x16xf32>
    %cst_107 = arith.constant dense<0.000000e+00> : vector<8x8xf32>
    %330 = tpu.matmul %328, %318, %cst_107 {dimension_numbers = #tpu.dot_dimension_numbers<[1], [0], [0], [1], [0, 0, 1, 1], [], []>} : vector<8x16xf32>, vector<16x8xf32>, vector<8x8xf32> -> vector<8x8xf32>
    %331 = vector.extract_strided_slice %198 {offsets = [8, 24], sizes = [8, 8], strides = [1, 1]} : vector<16x32xf32> to vector<8x8xf32>
    %332 = vector.extract_strided_slice %203 {offsets = [16, 24], sizes = [16, 8], strides = [1, 1]} : vector<32x32xf32> to vector<16x8xf32>
    %333 = vector.extract_strided_slice %208 {offsets = [16, 24], sizes = [16, 8], strides = [1, 1]} : vector<32x32xf32> to vector<16x8xf32>
    "tpu.trace_start"() <{level = 10 : i32, message = "qe,ke->qk"}> : () -> ()
    %cst_108 = arith.constant dense<0.000000e+00> : vector<8x16xf32>
    %334 = tpu.matmul %331, %332, %cst_108 {dimension_numbers = #tpu.dot_dimension_numbers<[1], [1], [0], [0], [0, 0, 1, 0], [], []>} : vector<8x8xf32>, vector<16x8xf32>, vector<8x16xf32> -> vector<8x16xf32>
    "tpu.trace_stop"() : () -> ()
    %cst_109 = arith.constant dense<0xFF800000> : vector<8xf32>
    %335 = vector.multi_reduction <maximumf>, %334, %cst_109 [1] : vector<8x16xf32> to vector<8xf32>
    %336 = vector.shape_cast %335 : vector<8xf32> to vector<8x1xf32>
    %337 = vector.broadcast %336 : vector<8x1xf32> to vector<8x16xf32>
    %338 = arith.subf %334, %337 : vector<8x16xf32>
    %339 = math.exp %338 : vector<8x16xf32>
    %cst_110 = arith.constant dense<0.000000e+00> : vector<8xf32>
    %340 = vector.multi_reduction <add>, %339, %cst_110 [1] : vector<8x16xf32> to vector<8xf32>
    %341 = vector.shape_cast %340 : vector<8xf32> to vector<8x1xf32>
    %342 = vector.broadcast %341 : vector<8x1xf32> to vector<8x16xf32>
    %343 = arith.divf %339, %342 : vector<8x16xf32>
    %344 = arith.addf %310, %343 : vector<8x16xf32>
    %cst_111 = arith.constant dense<0.000000e+00> : vector<8x8xf32>
    %345 = tpu.matmul %343, %333, %cst_111 {dimension_numbers = #tpu.dot_dimension_numbers<[1], [0], [0], [1], [0, 0, 1, 1], [], []>} : vector<8x16xf32>, vector<16x8xf32>, vector<8x8xf32> -> vector<8x8xf32>
    %346 = tpu.concatenate %330, %345 in 0 : vector<8x8xf32>, vector<8x8xf32> -> vector<16x8xf32>
    %347 = vector.extract_strided_slice %209 {offsets = [24, 0], sizes = [8, 32], strides = [1, 1]} : vector<32x32xf32> to vector<8x32xf32>
    %cst_112 = arith.constant dense<0.000000e+00> : vector<16x32xf32>
    %348 = tpu.matmul %346, %347, %cst_112 {dimension_numbers = #tpu.dot_dimension_numbers<[1], [0], [0], [1], [0, 0, 1, 1], [], []>} : vector<16x8xf32>, vector<8x32xf32>, vector<16x32xf32> -> vector<16x32xf32>
    %349 = arith.addf %315, %348 : vector<16x32xf32>
    %350 = vector.broadcast %210 : vector<1x32xf32> to vector<16x32xf32>
    %351 = arith.addf %349, %350 : vector<16x32xf32>
    %352 = tpu.concatenate %329, %344 in 0 : vector<8x16xf32>, vector<8x16xf32> -> vector<16x16xf32>
    %353 = arith.addf %191, %351 : vector<16x32xf32>
    %cst_113 = arith.constant dense<0.000000e+00> : vector<16xf32>
    %354 = vector.multi_reduction <add>, %353, %cst_113 [1] : vector<16x32xf32> to vector<16xf32>
    %355 = vector.shape_cast %354 : vector<16xf32> to vector<16x1xf32>
    %cst_114 = arith.constant 3.200000e+01 : f32
    %356 = vector.broadcast %cst_114 : f32 to vector<16x1xf32>
    %357 = arith.divf %355, %356 : vector<16x1xf32>
    %358 = vector.broadcast %357 : vector<16x1xf32> to vector<16x32xf32>
    %359 = arith.subf %353, %358 : vector<16x32xf32>
    %360 = arith.mulf %359, %359 : vector<16x32xf32>
    %cst_115 = arith.constant dense<0.000000e+00> : vector<16xf32>
    %361 = vector.multi_reduction <add>, %360, %cst_115 [1] : vector<16x32xf32> to vector<16xf32>
    %362 = vector.shape_cast %361 : vector<16xf32> to vector<16x1xf32>
    %cst_116 = arith.constant 3.200000e+01 : f32
    %363 = vector.broadcast %cst_116 : f32 to vector<16x1xf32>
    %364 = arith.divf %362, %363 : vector<16x1xf32>
    %365 = vector.broadcast %357 : vector<16x1xf32> to vector<16x32xf32>
    %366 = arith.subf %353, %365 : vector<16x32xf32>
    %cst_117 = arith.constant 9.99999974E-6 : f32
    %367 = vector.broadcast %cst_117 : f32 to vector<16x1xf32>
    %368 = arith.addf %364, %367 : vector<16x1xf32>
    %369 = math.rsqrt %368 : vector<16x1xf32>
    %370 = vector.broadcast %369 : vector<16x1xf32> to vector<16x32xf32>
    %371 = arith.mulf %366, %370 : vector<16x32xf32>
    %372 = vector.broadcast %15 : vector<1x32xf32> to vector<16x32xf32>
    %373 = arith.mulf %371, %372 : vector<16x32xf32>
    %374 = vector.broadcast %18 : vector<1x32xf32> to vector<16x32xf32>
    %375 = arith.addf %373, %374 : vector<16x32xf32>
    %cst_118 = arith.constant dense<0.000000e+00> : vector<16x64xf32>
    %376 = tpu.matmul %375, %8, %cst_118 {dimension_numbers = #tpu.dot_dimension_numbers<[1], [0], [0], [1], [0, 0, 1, 1], [], []>} : vector<16x32xf32>, vector<32x64xf32>, vector<16x64xf32> -> vector<16x64xf32>
    %377 = vector.broadcast %9 : vector<1x64xf32> to vector<16x64xf32>
    %378 = arith.addf %376, %377 : vector<16x64xf32>
    %cst_119 = arith.constant 0.000000e+00 : f32
    %379 = vector.broadcast %cst_119 : f32 to vector<16x64xf32>
    %380 = arith.maximumf %378, %379 : vector<16x64xf32>
    %cst_120 = arith.constant dense<0.000000e+00> : vector<16x32xf32>
    %381 = tpu.matmul %380, %10, %cst_120 {dimension_numbers = #tpu.dot_dimension_numbers<[1], [0], [0], [1], [0, 0, 1, 1], [], []>} : vector<16x64xf32>, vector<64x32xf32>, vector<16x32xf32> -> vector<16x32xf32>
    %382 = vector.broadcast %11 : vector<1x32xf32> to vector<16x32xf32>
    %383 = arith.addf %381, %382 : vector<16x32xf32>
    %384 = arith.addf %375, %383 : vector<16x32xf32>
    %cst_121 = arith.constant dense<0.000000e+00> : vector<16xf32>
    %385 = vector.multi_reduction <add>, %384, %cst_121 [1] : vector<16x32xf32> to vector<16xf32>
    %386 = vector.shape_cast %385 : vector<16xf32> to vector<16x1xf32>
    %cst_122 = arith.constant 3.200000e+01 : f32
    %387 = vector.broadcast %cst_122 : f32 to vector<16x1xf32>
    %388 = arith.divf %386, %387 : vector<16x1xf32>
    %389 = vector.broadcast %388 : vector<16x1xf32> to vector<16x32xf32>
    %390 = arith.subf %384, %389 : vector<16x32xf32>
    %391 = arith.mulf %390, %390 : vector<16x32xf32>
    %cst_123 = arith.constant dense<0.000000e+00> : vector<16xf32>
    %392 = vector.multi_reduction <add>, %391, %cst_123 [1] : vector<16x32xf32> to vector<16xf32>
    %393 = vector.shape_cast %392 : vector<16xf32> to vector<16x1xf32>
    %cst_124 = arith.constant 3.200000e+01 : f32
    %394 = vector.broadcast %cst_124 : f32 to vector<16x1xf32>
    %395 = arith.divf %393, %394 : vector<16x1xf32>
    %396 = vector.broadcast %388 : vector<16x1xf32> to vector<16x32xf32>
    %397 = arith.subf %384, %396 : vector<16x32xf32>
    %cst_125 = arith.constant 9.99999974E-6 : f32
    %398 = vector.broadcast %cst_125 : f32 to vector<16x1xf32>
    %399 = arith.addf %395, %398 : vector<16x1xf32>
    %400 = math.rsqrt %399 : vector<16x1xf32>
    %401 = vector.broadcast %400 : vector<16x1xf32> to vector<16x32xf32>
    %402 = arith.mulf %397, %401 : vector<16x32xf32>
    %403 = vector.broadcast %16 : vector<1x32xf32> to vector<16x32xf32>
    %404 = arith.mulf %402, %403 : vector<16x32xf32>
    %405 = vector.broadcast %19 : vector<1x32xf32> to vector<16x32xf32>
    %406 = arith.addf %404, %405 : vector<16x32xf32>
    %c0_126 = arith.constant 0 : index
    %c0_127 = arith.constant 0 : index
    %407 = vector.load %arg15[%c0_126, %c0_127] : memref<16x32xf32, #tpu.memory_space<vmem>>, vector<16x32xf32>
    tpu.vector_store %arg15[%c0_126, %c0_127], %406 {strides = array<i32>} : memref<16x32xf32, #tpu.memory_space<vmem>>, vector<16x32xf32>,
    %cst_128 = arith.constant 2.500000e-01 : f32
    %408 = vector.broadcast %cst_128 : f32 to vector<16x16xf32>
    %409 = arith.mulf %352, %408 : vector<16x16xf32>
    %c0_129 = arith.constant 0 : index
    %c0_130 = arith.constant 0 : index
    %410 = vector.load %arg16[%c0_129, %c0_130] : memref<16x16xf32, #tpu.memory_space<vmem>>, vector<16x16xf32>
    tpu.vector_store %arg16[%c0_129, %c0_130], %409 {strides = array<i32>} : memref<16x16xf32, #tpu.memory_space<vmem>>, vector<16x16xf32>,
    return
  }
  func.func @transform_0(%arg0: i32) -> (i32, i32) {
    %c0_i32 = arith.constant 0 : i32
    %c0_i32_0 = arith.constant 0 : i32
    %c0_i32_1 = arith.constant 0 : i32
    return %c0_i32, %c0_i32_0 : i32, i32
  }
  func.func @transform_1(%arg0: i32) -> (i32, i32) {
    %c0_i32 = arith.constant 0 : i32
    %c0_i32_0 = arith.constant 0 : i32
    %c0_i32_1 = arith.constant 0 : i32
    return %c0_i32, %c0_i32_0 : i32, i32
  }
  func.func @transform_2(%arg0: i32) -> (i32, i32) {
    %c0_i32 = arith.constant 0 : i32
    %c0_i32_0 = arith.constant 0 : i32
    %c0_i32_1 = arith.constant 0 : i32
    return %c0_i32, %c0_i32_0 : i32, i32
  }
  func.func @transform_3(%arg0: i32) -> (i32, i32) {
    %c0_i32 = arith.constant 0 : i32
    %c0_i32_0 = arith.constant 0 : i32
    %c0_i32_1 = arith.constant 0 : i32
    return %c0_i32, %c0_i32_0 : i32, i32
  }
  func.func @transform_4(%arg0: i32) -> (i32, i32) {
    %c0_i32 = arith.constant 0 : i32
    %c0_i32_0 = arith.constant 0 : i32
    %c0_i32_1 = arith.constant 0 : i32
    return %c0_i32, %c0_i32_0 : i32, i32
  }
  func.func @transform_5(%arg0: i32) -> (i32, i32) {
    %c0_i32 = arith.constant 0 : i32
    %c0_i32_0 = arith.constant 0 : i32
    %c0_i32_1 = arith.constant 0 : i32
    return %c0_i32, %c0_i32_0 : i32, i32
  }
  func.func @transform_6(%arg0: i32) -> (i32, i32) {
    %c0_i32 = arith.constant 0 : i32
    %c0_i32_0 = arith.constant 0 : i32
    %c0_i32_1 = arith.constant 0 : i32
    return %c0_i32, %c0_i32_0 : i32, i32
  }
  func.func @transform_7(%arg0: i32) -> (i32, i32) {
    %c0_i32 = arith.constant 0 : i32
    %c0_i32_0 = arith.constant 0 : i32
    %c0_i32_1 = arith.constant 0 : i32
    return %c0_i32, %c0_i32_0 : i32, i32
  }
  func.func @transform_8(%arg0: i32) -> (i32, i32) {
    %c0_i32 = arith.constant 0 : i32
    %c0_i32_0 = arith.constant 0 : i32
    %c0_i32_1 = arith.constant 0 : i32
    return %c0_i32, %c0_i32_0 : i32, i32
  }
  func.func @transform_9(%arg0: i32) -> (i32, i32) {
    %c0_i32 = arith.constant 0 : i32
    %c0_i32_0 = arith.constant 0 : i32
    %c0_i32_1 = arith.constant 0 : i32
    return %c0_i32, %c0_i32_0 : i32, i32
  }
  func.func @transform_10(%arg0: i32) -> (i32, i32) {
    %c0_i32 = arith.constant 0 : i32
    %c0_i32_0 = arith.constant 0 : i32
    %c0_i32_1 = arith.constant 0 : i32
    return %c0_i32, %c0_i32_0 : i32, i32
  }
  func.func @transform_11(%arg0: i32) -> (i32, i32) {
    %c0_i32 = arith.constant 0 : i32
    %c0_i32_0 = arith.constant 0 : i32
    %c0_i32_1 = arith.constant 0 : i32
    return %c0_i32, %c0_i32_0 : i32, i32
  }
  func.func @transform_12(%arg0: i32) -> (i32, i32) {
    %c0_i32 = arith.constant 0 : i32
    %c0_i32_0 = arith.constant 0 : i32
    %c0_i32_1 = arith.constant 0 : i32
    return %c0_i32, %c0_i32_0 : i32, i32
  }
  func.func @transform_13(%arg0: i32) -> (i32, i32) {
    %c0_i32 = arith.constant 0 : i32
    %c0_i32_0 = arith.constant 0 : i32
    %c0_i32_1 = arith.constant 0 : i32
    return %c0_i32, %c0_i32_0 : i32, i32
  }
  func.func @transform_14(%arg0: i32) -> (i32, i32) {
    %c0_i32 = arith.constant 0 : i32
    %c0_i32_0 = arith.constant 0 : i32
    %c0_i32_1 = arith.constant 0 : i32
    return %c0_i32, %c0_i32_0 : i32, i32
  }
  func.func @transform_15(%arg0: i32) -> (i32, i32) {
    %c0_i32 = arith.constant 0 : i32
    %c0_i32_0 = arith.constant 0 : i32
    %c0_i32_1 = arith.constant 0 : i32
    return %c0_i32, %c0_i32_0 : i32, i32
  }
}

</mosaic_0001>

<bundles_post_ra>
// kernel: transformer_decoder_layer_forward.1
= control target key start
LH: loop header
LB: loop body
LE: loop exit
PB: predicated region body
PF: predicated region fallthrough
CT: control target
= control target key end

     0   :  { %s3205_s0 = inlined_call_operand.vmem [shape: f32[16,32], index: 0, kind: input, shape index: {}]   ;;  %s3206_s1 = inlined_call_operand.vmem [shape: f32[16,32], index: 1, kind: input, shape index: {}]   ;;  %s3207_s2 = inlined_call_operand.vmem [shape: f32[32,32], index: 2, kind: input, shape index: {}]   ;;  %s3208_s3 = inlined_call_operand.vmem [shape: f32[32,32], index: 3, kind: input, shape index: {}]   ;;  %s3209_s4 = inlined_call_operand.vmem [shape: f32[32,128], index: 4, kind: input, shape index: {}]   ;;  %s3210_s5 = inlined_call_operand.vmem [shape: f32[1,128], index: 5, kind: input, shape index: {}]   ;;  %s3211_s6 = inlined_call_operand.vmem [shape: f32[32,128], index: 6, kind: input, shape index: {}]   ;;  %s3212_s7 = inlined_call_operand.vmem [shape: f32[1,128], index: 7, kind: input, shape index: {}]   ;;  %s3213_s8 = inlined_call_operand.vmem [shape: f32[32,64], index: 8, kind: input, shape index: {}]   ;;  %s3214_s9 = inlined_call_operand.vmem [shape: f32[1,64], index: 9, kind: input, shape index: {}]   ;;  %s3215_s10 = inlined_call_operand.vmem [shape: f32[64,32], index: 10, kind: input, shape index: {}]   ;;  %s3216_s11 = inlined_call_operand.vmem [shape: f32[1,32], index: 11, kind: input, shape index: {}]   ;;  %s3217_s12 = inlined_call_operand.vmem [shape: f32[3,32], index: 12, kind: input, shape index: {}]   ;;  %s3218_s13 = inlined_call_operand.vmem [shape: f32[3,32], index: 13, kind: input, shape index: {}]   ;;  %s3219_s14 = inlined_call_operand.vmem [shape: f32[16,32], index: 14, kind: output, shape index: {0}]   ;;  %s3220_s15 = inlined_call_operand.hbm [shape: f32[16,16], index: 15, kind: output, shape index: {1}]  }
   0x1   :  { %v2562_v0 = vld [vmem:[%s3210_s5] ss:$0 sm:$0xff]  ;;  %v2567_v1 = vld [vmem:[%s3209_s4 + $0x10] sm:$0xff]  ;;  %v2572_v2 = vld [vmem:[%s3209_s4 + $0x18] sm:$0xff]  ;;  %s2469_s5 = smov 96  }
   0x2   :  { %v2577_v3 = vld [vmem:[%s3209_s4] sm:$0xff]  ;;  %v2582_v4 = vld [vmem:[%s3209_s4 + $0x8] sm:$0xff]  ;;  %139 = vrot.lane.b32.xlu1 %v2562_v0, %s2469_s5  ;;  %v2289_v5 = vpack.i.bf16 %v2567_v1, %v2572_v2  ;;  %112 = vmatpush.msra.mxu0 %v2572_v2 }
   0x3   :  { %v2304_v6 = vpack.i.bf16 %v2577_v3, %v2582_v4 }
   0x4   :  { %21 = vsyncpa [#allocation3], 0  ;;  %2290 = vrot.lane.b32.xlu0 %v2289_v5, %s2469_s5  ;;  %s2470_s28 = smov 64   ;;  %113 = vmatpush.msra.mxu0 %v2567_v1  ;;  %v2603_v7 = vld [vmem:[%s3205_s0] sm:$0xff]  ;;  %vm93_vm0 = vcmask 261120   ;;  %v2616_v10 = vld [vmem:[%s3205_s0 + $0x8] sm:$0xff] }
   0x5   :  { %2305 = vrot.lane.b32.xlu2 %v2304_v6, %s2470_s28  ;;  %v2608_v8 = vld [vmem:[%s3206_s1] sm:$0xff]  ;;  %v2621_v11 = vld [vmem:[%s3206_s1 + $0x8] sm:$0xff]  ;;  %vm209_vm1 = vcmask 64512   ;;  %s2471_s0 = smov 120   ;;  %s2472_s1 = smov 112  }
   0x6   :  { %114 = vmatpush.msra.mxu0 %v2582_v4  ;;  %v88_v9 = vadd.f32 %v2608_v8, %v2603_v7  ;;  %v89_v12 = vadd.f32 %v2621_v11, %v2616_v10  ;;  %s2473_s21 = smov 104   ;;  %s2474_s22 = smov 32  }
   0x7   :  { %s2478_s23 = smov 8  }
   0x8   :  { %115 = vmatpush.msra.mxu0 %v2577_v3 }
   0x9   :  { %2187 = vmatmul.msk.f32.vlgmr.msra.gmra.mxu0 %vm93_vm0, %v88_v9 }
   0xa   :  { %2300 = vrot.lane.b32.xlu1 %v2289_v5, %s2470_s28 }
   0xc   :  { %2295 = vrot.lane.b32.xlu0 %v2304_v6, %s2469_s5 }
  0x11   :  { %2188 = vmatmul.msk.f32.gmra.mxu0 %vm93_vm0, %v89_v12 }
  0x12   :  { %177 = vrot.lane.b32.xlu1 %v2562_v0, %s2470_s28 }
  0x5f   :  { %v2306_v18 = vpop.permute.xlu2 %2305 }
  0x60   :  { %v2307_v23 = vunpack.i.l.bf16 %v2306_v18  ;;  %v2308_v25 = vunpack.i.h.bf16 %v2306_v18 }
  0x74   :  { %v140_v13 = vpop.permute.xlu1 %139 }
  0x76   :  { %v2291_v14 = vpop.permute.xlu0 %2290 }
  0x77   :  { %v2292_v15 = vunpack.i.l.bf16 %v2291_v14  ;;  %v2293_v16 = vunpack.i.h.bf16 %v2291_v14 }
  0x79   :  { %154 = vmatpush.msra.mxu1 %v2292_v15 }
  0x7b   :  { %155 = vmatpush.msra.mxu1 %v2293_v16 }
  0x7c   :  { %v2301_v17 = vpop.permute.xlu1 %2300 }
  0x7d   :  { %v2302_v19 = vunpack.i.l.bf16 %v2301_v17  ;;  %v2303_v20 = vunpack.i.h.bf16 %v2301_v17 }
  0x7e   :  { %v2296_v21 = vpop.permute.xlu0 %2295 }
  0x7f   :  { %v2297_v22 = vunpack.i.l.bf16 %v2296_v21  ;;  %198 = vmatpush.msra.mxu2 %v2302_v19  ;;  %v2298_v24 = vunpack.i.h.bf16 %v2296_v21 }
  0x81   :  { %156 = vmatpush.msra.mxu1 %v2297_v22  ;;  %199 = vmatpush.msra.mxu2 %v2303_v20 }
  0x83   :  { %157 = vmatpush.msra.mxu1 %v2298_v24  ;;  %200 = vmatpush.msra.mxu2 %v2307_v23 }
  0x84   :  { %2189 = vmatmul.msk.f32.vlgmr.msra.gmra.mxu1 %vm93_vm0, %v88_v9  ;;  %v178_v30 = vpop.permute.xlu1 %177 }
  0x85   :  { %201 = vmatpush.msra.mxu2 %v2308_v25 }
  0x86   :  { %2191 = vmatmul.msk.f32.vlgmr.msra.gmra.mxu2 %vm93_vm0, %v2603_v7  ;;  %v117_v26 = vpop.f32.mrf.mxu0 }
  0x87   :  { %v2635_v29 = vadd.f32 %v2562_v0, %v117_v26 }
  0x8c   :  { %2190 = vmatmul.msk.f32.gmra.mxu1 %vm93_vm0, %v89_v12 }
  0x8e   :  { %2192 = vmatmul.msk.f32.gmra.mxu2 %vm93_vm0, %v2616_v10  ;;  %v120_v35 = vpop.f32.mrf.mxu0 }
  0x8f   :  { %v2655_v36 = vadd.f32 %v2562_v0, %v120_v35 }
 0x101   :  { %v159_v27 = vpop.f32.mrf.mxu1 }
 0x102   :  { %v2632_v28 = vadd.f32 %v159_v27, %v140_v13 }
 0x104   :  { %358 = vrot.lane.b32.xlu1 %v2632_v28, %s2471_s0  ;;  %2193 = vmatpush.xpose.msk.msrb.mxu0 %vm209_vm1, %v2632_v28 }
 0x107   :  { %2194 = vmatmul.msk.f32.vlgmr.msrb.gmra.mxu0 %vm209_vm1, %v2635_v29 }
 0x109   :  { %v162_v31 = vpop.f32.mrf.mxu1  ;;  %v203_v32 = vpop.f32.mrf.mxu2 }
 0x10a   :  { %v2643_v33 = vadd.f32 %v203_v32, %v178_v30  ;;  %v2645_v34 = vadd.f32 %v162_v31, %v140_v13 }
 0x10c   :  { %356 = vrot.lane.b32.xlu1 %v2635_v29, %s2471_s0  ;;  %278 = vmatpush.msra.mxu3 %v2643_v33 }
 0x10e   :  { %2196 = vmatpush.xpose.msk.msrb.mxu3 %vm209_vm1, %v2645_v34 }
 0x111   :  { %v206_v48 = vpop.f32.mrf.mxu2 }
 0x112   :  { %v2672_v49 = vadd.f32 %v206_v48, %v178_v30 }
 0x114   :  { %437 = vrot.lane.b32.xlu1 %v2645_v34, %s2471_s0  ;;  %351 = vmatpush.msra.mxu0 %v2672_v49 }
 0x11c   :  { %435 = vrot.lane.b32.xlu1 %v2655_v36, %s2471_s0 }
 0x124   :  { %578 = vrot.lane.b32.xlu1 %v2635_v29, %s2472_s1 }
 0x12c   :  { %656 = vrot.lane.b32.xlu1 %v2655_v36, %s2472_s1 }
 0x176   :  { %v359_v37 = vpop.permute.xlu1 %358 }
 0x177   :  { %2199 = vmatpush.xpose.msk.msrb.mxu1 %vm209_vm1, %v359_v37 }
 0x17e   :  { %v357_v38 = vpop.permute.xlu1 %356 }
 0x17f   :  { %2200 = vmatmul.msk.f32.vlgmr.msrb.gmra.mxu1 %vm209_vm1, %v357_v38 }
 0x184   :  { %v233_v39 = vpop.f32.mrf.mxu0 }
 0x185   :  { %v236_v40 = vsel %vm209_vm1, %v233_v39, -inf }
 0x186   :  { %237 = vmax.xlane.f32.xlu2 %v236_v40  ;;  %v438_v62 = vpop.permute.xlu1 %437 }
 0x18e   :  { %v436_v5 = vpop.permute.xlu1 %435 }
 0x196   :  { %v579_v9 = vpop.permute.xlu1 %578 }
 0x19e   :  { %580 = vrot.lane.b32.xlu2 %v2632_v28, %s2472_s1  ;;  %v657_v12 = vpop.permute.xlu1 %656 }
 0x1f9   :  { %v238_v41 = vpop.xlane.xlu2 %237 }
 0x1fa   :  { %v239_v42 = vsub.f32 %v233_v39, %v238_v41 }
 0x1fc   :  { %v240_v43 = vmul.f32 1.442695, %v239_v42  ;;  %v381_v46 = vpop.f32.mrf.mxu1 }
 0x1fd   :  { %v384_v47 = vsel %vm209_vm1, %v381_v46, -inf }
 0x1fe   :  { %2363 = vpow2.f32 %v240_v43 }
 0x201   :  { %v581_v63 = vpop.permute.xlu2 %580 }
 0x204   :  { %v2364_v44 = vpop.eup %2363 }
 0x205   :  { %v242_v45 = vsel %vm209_vm1, %v2364_v44, 0.0 }
 0x206   :  { %243 = vadd.xlane.f32.xlu0 %v242_v45 }
 0x21a   :  { %658 = vrot.lane.b32.xlu0 %v2645_v34, %s2472_s1 }
 0x244   :  { %385 = vmax.xlane.f32.xlu0 %v384_v47 }
 0x279   :  { %v244_v50 = vpop.xlane.xlu0 %243 }
 0x27a   :  { %2365 = vrcp.f32 %v244_v50  ;;  %v256_v54 = vand.u32 2147483648, %v244_v50  ;;  %v254_v56 = vand.u32 2147483647, %v244_v50  ;;  %vm250_vm3 = vweird.f32 %v244_v50 }
 0x27c   :  { %v257_v58 = vor.u32 1.1754944e-38, %v256_v54  ;;  %vm255_vm5 = vcmp.eq.f32.partialorder %v254_v56, 8.507059e+37 }
 0x280   :  { %v2366_v51 = vpop.eup %2365 }
 0x281   :  { %v246_v52 = vmul.f32 %v2366_v51, %v244_v50  ;;  %vm251_vm2 = vweird.f32 %v2366_v51 }
 0x282   :  { %vm252_vm4 = vmor %vm250_vm3, %vm251_vm2 }
 0x283   :  { %v247_v53 = vsub.f32 1.0, %v246_v52 }
 0x285   :  { %v248_v55 = vmul.f32 %v2366_v51, %v247_v53 }
 0x287   :  { %v249_v57 = vadd.f32 %v2366_v51, %v248_v55 }
 0x289   :  { %v253_v59 = vsel %vm252_vm4, %v2366_v51, %v249_v57 }
 0x28a   :  { %v258_v60 = vsel %vm255_vm5, %v257_v58, %v253_v59 }
 0x28b   :  { %v259_v61 = vmul.f32 %v2364_v44, %v258_v60 }
 0x28c   :  { %v659_v6 = vpop.permute.xlu0 %658 }
 0x28d   :  { %2195 = vmatmul.msk.f32.vlgmr.msra.gmra.mxu3 %vm209_vm1, %v259_v61 }
 0x28e   :  { %2202 = vmatpush.xpose.msk.msra.mxu3 %vm209_vm1, %v438_v62 }
 0x295   :  { %2197 = vmatmul.msk.f32.vlgmr.msrb.gmra.mxu3 %vm209_vm1, %v2655_v36 }
 0x296   :  { %2209 = vmatpush.xpose.msk.msrb.mxu3 %vm209_vm1, %v581_v63 }
 0x29d   :  { %2203 = vmatmul.msk.f32.vlgmr.msra.gmra.mxu3 %vm209_vm1, %v436_v5 }
 0x29e   :  { %2212 = vmatpush.xpose.msk.msra.mxu3 %vm209_vm1, %v659_v6 }
 0x2a5   :  { %2210 = vmatmul.msk.f32.vlgmr.msrb.gmra.mxu3 %vm209_vm1, %v579_v9 }
 0x2ad   :  { %2213 = vmatmul.msk.f32.vlgmr.msra.gmra.mxu3 %vm209_vm1, %v657_v12 }
 0x2b7   :  { %v386_v14 = vpop.xlane.xlu0 %385 }
 0x2b8   :  { %v387_v15 = vsub.f32 %v381_v46, %v386_v14 }
 0x2ba   :  { %v388_v18 = vmul.f32 1.442695, %v387_v15 }
 0x2bc   :  { %2367 = vpow2.f32 %v388_v18 }
 0x2c2   :  { %v2368_v21 = vpop.eup %2367 }
 0x2c3   :  { %v390_v23 = vsel %vm209_vm1, %v2368_v21, 0.0 }
 0x310   :  { %v2684_v13 = vpop.f32.mrf.mxu3 }
 0x318   :  { %v306_v16 = vpop.f32.mrf.mxu3 }
 0x319   :  { %v309_v17 = vsel %vm209_vm1, %v306_v16, -inf }
 0x31a   :  { %310 = vmax.xlane.f32.xlu1 %v309_v17 }
 0x320   :  { %v460_v19 = vpop.f32.mrf.mxu3 }
 0x321   :  { %v463_v20 = vsel %vm209_vm1, %v460_v19, -inf }
 0x322   :  { %464 = vmax.xlane.f32.xlu1 %v463_v20 }
 0x328   :  { %v603_v22 = vpop.f32.mrf.mxu3 }
 0x329   :  { %v606_v38 = vsel %vm209_vm1, %v603_v22, -inf }
 0x32a   :  { %391 = vadd.xlane.f32.xlu1 %v390_v23 }
 0x330   :  { %v2689_v24 = vpop.f32.mrf.mxu3 }
 0x331   :  { %v684_v25 = vsel %vm209_vm1, %v2689_v24, -inf }
 0x332   :  { %685 = vmax.xlane.f32.xlu0 %v684_v25 }
 0x346   :  { %409 = vrot.lane.b32.xlu0 %v2643_v33, %s2471_s0 }
 0x34e   :  { %630 = vrot.lane.b32.xlu0 %v2643_v33, %s2472_s1 }
 0x356   :  { %768 = vrot.lane.b32.xlu0 %v2635_v29, %s2473_s21 }
 0x35e   :  { %848 = vrot.lane.b32.xlu0 %v2645_v34, %s2473_s21 }
 0x38d   :  { %v311_v26 = vpop.xlane.xlu1 %310 }
 0x38e   :  { %v312_v27 = vsub.f32 %v306_v16, %v311_v26 }
 0x390   :  { %v313_v30 = vmul.f32 1.442695, %v312_v27 }
 0x392   :  { %2369 = vpow2.f32 %v313_v30 }
 0x395   :  { %v465_v31 = vpop.xlane.xlu1 %464 }
 0x396   :  { %v466_v51 = vsub.f32 %v460_v19, %v465_v31 }
 0x398   :  { %v2370_v32 = vpop.eup %2369  ;;  %v467_v52 = vmul.f32 1.442695, %v466_v51 }
 0x399   :  { %v315_v35 = vsel %vm209_vm1, %v2370_v32, 0.0 }
 0x39a   :  { %316 = vadd.xlane.f32.xlu2 %v315_v35 }
 0x39d   :  { %v392_v37 = vpop.xlane.xlu1 %391 }
 0x39e   :  { %2371 = vrcp.f32 %v392_v37  ;;  %v404_v34 = vand.u32 2147483648, %v392_v37  ;;  %vm398_vm7 = vweird.f32 %v392_v37  ;;  %v402_v43 = vand.u32 2147483647, %v392_v37 }
 0x39f   :  { %2373 = vpow2.f32 %v467_v52 }
 0x3a0   :  { %v405_v46 = vor.u32 1.1754944e-38, %v404_v34  ;;  %vm403_vm9 = vcmp.eq.f32.partialorder %v402_v43, 8.507059e+37 }
 0x3a2   :  { %607 = vmax.xlane.f32.xlu2 %v606_v38 }
 0x3a4   :  { %v2372_v39 = vpop.eup %2371 }
 0x3a5   :  { %v394_v40 = vmul.f32 %v2372_v39, %v392_v37  ;;  %vm399_vm6 = vweird.f32 %v2372_v39  ;;  %v686_v44 = vpop.xlane.xlu0 %685  ;;  %v2706_v53 = vpop.eup %2373 }
 0x3a6   :  { %vm400_vm8 = vmor %vm398_vm7, %vm399_vm6  ;;  %v469_v54 = vsel %vm209_vm1, %v2706_v53, 0.0  ;;  %v687_v60 = vsub.f32 %v2689_v24, %v686_v44 }
 0x3a7   :  { %v395_v29 = vsub.f32 1.0, %v394_v40 }
 0x3a8   :  { %v688_v6 = vmul.f32 1.442695, %v687_v60 }
 0x3a9   :  { %v396_v41 = vmul.f32 %v2372_v39, %v395_v29 }
 0x3ab   :  { %v397_v42 = vadd.f32 %v2372_v39, %v396_v41 }
 0x3ad   :  { %v401_v45 = vsel %vm400_vm8, %v2372_v39, %v397_v42 }
 0x3ae   :  { %v406_v47 = vsel %vm403_vm9, %v405_v46, %v401_v45 }
 0x3af   :  { %v407_v50 = vmul.f32 %v2368_v21, %v406_v47 }
 0x3b8   :  { %v410_v48 = vpop.permute.xlu0 %409 }
 0x3b9   :  { %430 = vmatpush.msrb.mxu2 %v410_v48 }
 0x3ba   :  { %2201 = vmatmul.msk.f32.vlgmr.msrb.gmra.mxu2 %vm209_vm1, %v407_v50  ;;  %546 = vrot.lane.b32.xlu2 %v2577_v3, %s2474_s22 }
 0x3c0   :  { %v631_v23 = vpop.permute.xlu0 %630 }
 0x3c8   :  { %v769_v31 = vpop.permute.xlu0 %768 }
 0x3e3   :  { %470 = vadd.xlane.f32.xlu2 %v469_v54 }
 0x3fb   :  { %770 = vrot.lane.b32.xlu2 %v2632_v28, %s2473_s21 }
 0x403   :  { %708 = vrot.lane.b32.xlu2 %v2672_v49, %s2472_s1 }
 0x40b   :  { %846 = vrot.lane.b32.xlu2 %v2655_v36, %s2473_s21 }
 0x40d   :  { %v317_v55 = vpop.xlane.xlu2 %316 }
 0x40e   :  { %2375 = vrcp.f32 %v317_v55  ;;  %v329_v61 = vand.u32 2147483648, %v317_v55  ;;  %v327_v28 = vand.u32 2147483647, %v317_v55  ;;  %vm323_vm11 = vweird.f32 %v317_v55 }
 0x410   :  { %v330_v36 = vor.u32 1.1754944e-38, %v329_v61  ;;  %vm328_vm13 = vcmp.eq.f32.partialorder %v327_v28, 8.507059e+37 }
 0x414   :  { %v2376_v3 = vpop.eup %2375 }
 0x415   :  { %v319_v56 = vmul.f32 %v2376_v3, %v317_v55  ;;  %v608_v57 = vpop.xlane.xlu2 %607  ;;  %vm324_vm10 = vweird.f32 %v2376_v3 }
 0x416   :  { %v609_v58 = vsub.f32 %v603_v22, %v608_v57  ;;  %vm325_vm12 = vmor %vm323_vm11, %vm324_vm10 }
 0x417   :  { %v320_v59 = vsub.f32 1.0, %v319_v56 }
 0x418   :  { %v610_v62 = vmul.f32 1.442695, %v609_v58 }
 0x419   :  { %v321_v63 = vmul.f32 %v2376_v3, %v320_v59 }
 0x41a   :  { %2377 = vpow2.f32 %v610_v62 }
 0x41b   :  { %v322_v5 = vadd.f32 %v2376_v3, %v321_v63  ;;  %2379 = vpow2.f32 %v688_v6 }
 0x41d   :  { %v326_v9 = vsel %vm325_vm12, %v2376_v3, %v322_v5  ;;  %v547_v12 = vpop.permute.xlu2 %546 }
 0x41e   :  { %v331_v14 = vsel %vm328_vm13, %v330_v36, %v326_v9  ;;  %570 = vmatpush.msra.mxu2 %v547_v12 }
 0x41f   :  { %2207 = vmatmul.msk.f32.vlgmr.msra.gmra.mxu2 %vm209_vm1, %v2684_v13  ;;  %v332_v15 = vmul.f32 %v2370_v32, %v331_v14 }
 0x420   :  { %v2719_v16 = vpop.eup %2377 }
 0x421   :  { %2198 = vmatmul.msk.f32.vlgmr.msra.gmra.mxu0 %vm209_vm1, %v332_v15  ;;  %v612_v17 = vsel %vm209_vm1, %v2719_v16, 0.0  ;;  %v2724_v18 = vpop.eup %2379 }
 0x422   :  { %613 = vadd.xlane.f32.xlu1 %v612_v17  ;;  %v690_v19 = vsel %vm209_vm1, %v2724_v18, 0.0 }
 0x42a   :  { %691 = vadd.xlane.f32.xlu1 %v690_v19 }
 0x43d   :  { %v2741_v6 = vpop.f32.mrf.mxu2 }
 0x443   :  { %488 = vrot.lane.b32.xlu1 %v2672_v49, %s2471_s0 }
 0x456   :  { %v471_v13 = vpop.xlane.xlu2 %470 }
 0x457   :  { %2381 = vrcp.f32 %v471_v13  ;;  %v483_v40 = vand.u32 2147483648, %v471_v13  ;;  %vm477_vm15 = vweird.f32 %v471_v13  ;;  %v481_v29 = vand.u32 2147483647, %v471_v13 }
 0x459   :  { %v484_v43 = vor.u32 1.1754944e-38, %v483_v40  ;;  %vm482_vm3 = vcmp.eq.f32.partialorder %v481_v29, 8.507059e+37 }
 0x45d   :  { %v2382_v22 = vpop.eup %2381 }
 0x45e   :  { %v771_v20 = vpop.permute.xlu2 %770  ;;  %v473_v25 = vmul.f32 %v2382_v22, %v471_v13  ;;  %vm478_vm14 = vweird.f32 %v2382_v22 }
 0x45f   :  { %2217 = vmatpush.xpose.msk.msrb.mxu2 %vm209_vm1, %v771_v20  ;;  %vm479_vm2 = vmor %vm477_vm15, %vm478_vm14 }
 0x460   :  { %v474_v26 = vsub.f32 1.0, %v473_v25 }
 0x462   :  { %v475_v32 = vmul.f32 %v2382_v22, %v474_v26 }
 0x464   :  { %v476_v37 = vadd.f32 %v2382_v22, %v475_v32 }
 0x466   :  { %v480_v41 = vsel %vm479_vm2, %v2382_v22, %v476_v37  ;;  %v709_v55 = vpop.permute.xlu2 %708 }
 0x467   :  { %v485_v44 = vsel %vm482_vm3, %v484_v43, %v480_v41 }
 0x468   :  { %v486_v51 = vmul.f32 %v2706_v53, %v485_v44  ;;  %v849_v53 = vpop.permute.xlu0 %848 }
 0x46e   :  { %v847_v5 = vpop.permute.xlu2 %846 }
 0x495   :  { %v614_v21 = vpop.xlane.xlu1 %613 }
 0x496   :  { %2383 = vrcp.f32 %v614_v21  ;;  %v626_v47 = vand.u32 2147483648, %v614_v21  ;;  %vm620_vm5 = vweird.f32 %v614_v21  ;;  %v624_v48 = vand.u32 2147483647, %v614_v21 }
 0x498   :  { %v627_v3 = vor.u32 1.1754944e-38, %v626_v47  ;;  %vm625_vm7 = vcmp.eq.f32.partialorder %v624_v48, 8.507059e+37 }
 0x49c   :  { %v2384_v30 = vpop.eup %2383 }
 0x49d   :  { %v692_v27 = vpop.xlane.xlu1 %691  ;;  %v616_v35 = vmul.f32 %v2384_v30, %v614_v21  ;;  %vm621_vm4 = vweird.f32 %v2384_v30 }
 0x49e   :  { %v353_v24 = vpop.f32.mrf.mxu0  ;;  %2385 = vrcp.f32 %v692_v27  ;;  %vm622_vm6 = vmor %vm620_vm5, %vm621_vm4  ;;  %v704_v58 = vand.u32 2147483648, %v692_v27  ;;  %vm698_vm9 = vweird.f32 %v692_v27  ;;  %v702_v59 = vand.u32 2147483647, %v692_v27 }
 0x49f   :  { %2208 = vmatmul.msk.f32.gmra.mxu2 %vm209_vm1, %v353_v24  ;;  %v617_v38 = vsub.f32 1.0, %v616_v35 }
 0x4a0   :  { %v705_v62 = vor.u32 1.1754944e-38, %v704_v58  ;;  %vm703_vm11 = vcmp.eq.f32.partialorder %v702_v59, 8.507059e+37 }
 0x4a1   :  { %v618_v42 = vmul.f32 %v2384_v30, %v617_v38 }
 0x4a2   :  { %v2743_v36 = vpop.f32.mrf.mxu2 }
 0x4a3   :  { %v619_v45 = vadd.f32 %v2384_v30, %v618_v42 }
 0x4a4   :  { %v2386_v39 = vpop.eup %2385 }
 0x4a5   :  { %v694_v34 = vmul.f32 %v2386_v39, %v692_v27  ;;  %v623_v52 = vsel %vm622_vm6, %v2384_v30, %v619_v45  ;;  %vm699_vm8 = vweird.f32 %v2386_v39 }
 0x4a6   :  { %v628_v56 = vsel %vm625_vm7, %v627_v3, %v623_v52  ;;  %vm700_vm10 = vmor %vm698_vm9, %vm699_vm8 }
 0x4a7   :  { %2218 = vmatmul.msk.f32.vlgmr.msrb.gmra.mxu2 %vm209_vm1, %v769_v31  ;;  %v695_v46 = vsub.f32 1.0, %v694_v34  ;;  %v629_v60 = vmul.f32 %v2719_v16, %v628_v56 }
 0x4a9   :  { %v696_v54 = vmul.f32 %v2386_v39, %v695_v46 }
 0x4ab   :  { %v697_v57 = vadd.f32 %v2386_v39, %v696_v54 }
 0x4ad   :  { %v701_v61 = vsel %vm700_vm10, %v2386_v39, %v697_v57 }
 0x4ae   :  { %v706_v63 = vsel %vm703_vm11, %v705_v62, %v701_v61 }
 0x4af   :  { %v707_v28 = vmul.f32 %v2724_v18, %v706_v63 }
 0x4b5   :  { %v489_v50 = vpop.permute.xlu1 %488 }
 0x4b6   :  { %509 = vmatpush.msrb.mxu0 %v489_v50 }
 0x4b7   :  { %2204 = vmatmul.msk.f32.vlgmr.msrb.gmra.mxu0 %vm209_vm1, %v486_v51 }
 0x4b8   :  { %651 = vmatpush.msra.mxu0 %v631_v23 }
 0x4ba   :  { %729 = vmatpush.msrb.mxu0 %v709_v55 }
 0x4bf   :  { %2211 = vmatmul.msk.f32.vlgmr.msra.gmra.mxu0 %vm209_vm1, %v629_v60 }
 0x4c0   :  { %2220 = vmatpush.xpose.msk.msra.mxu0 %vm209_vm1, %v849_v53 }
 0x4c7   :  { %2214 = vmatmul.msk.f32.vlgmr.msrb.gmra.mxu0 %vm209_vm1, %v707_v28 }
 0x4cf   :  { %2221 = vmatmul.msk.f32.vlgmr.msra.gmra.mxu0 %vm209_vm1, %v847_v5 }
 0x522   :  { %v2745_v9 = vpop.f32.mrf.mxu2 }
 0x52a   :  { %v793_v12 = vpop.f32.mrf.mxu2 }
 0x52b   :  { %v796_v14 = vsel %vm209_vm1, %v793_v12, -inf }
 0x52c   :  { %797 = vmax.xlane.f32.xlu1 %v796_v14  ;;  %v2787_v14 = vld [vmem:[%s3211_s6 + $0x18] sm:$0xff] }
 0x52d   :  { %1049 = vmatpush.msrb.mxu0 %v2787_v14 }
 0x534   :  { %v2748_v15 = vpop.f32.mrf.mxu0 }
 0x53c   :  { %v2750_v16 = vpop.f32.mrf.mxu0 }
 0x544   :  { %v2752_v17 = vpop.f32.mrf.mxu0 }
 0x54c   :  { %v871_v18 = vpop.f32.mrf.mxu0 }
 0x54d   :  { %v874_v19 = vsel %vm209_vm1, %v871_v18, -inf }
 0x54e   :  { %875 = vmax.xlane.f32.xlu0 %v874_v19 }
 0x562   :  { %820 = vrot.lane.b32.xlu0 %v2643_v33, %s2473_s21 }
 0x56a   :  { %924 = vrot.lane.b32.xlu0 %v2572_v2, %s2474_s22 }
 0x572   :  { %734 = vrot.lane.b32.xlu0 %v2567_v1, %s2474_s22 }
 0x59f   :  { %v798_v13 = vpop.xlane.xlu1 %797 }
 0x5a0   :  { %v799_v20 = vsub.f32 %v793_v12, %v798_v13 }
 0x5a2   :  { %v800_v21 = vmul.f32 1.442695, %v799_v20 }
 0x5a4   :  { %2387 = vpow2.f32 %v800_v21 }
 0x5aa   :  { %v2388_v22 = vpop.eup %2387 }
 0x5ab   :  { %v802_v23 = vsel %vm209_vm1, %v2388_v22, 0.0 }
 0x5ac   :  { %803 = vadd.xlane.f32.xlu2 %v802_v23 }
 0x5c1   :  { %v876_v24 = vpop.xlane.xlu0 %875 }
 0x5c2   :  { %v877_v25 = vsub.f32 %v871_v18, %v876_v24 }
 0x5c4   :  { %v878_v26 = vmul.f32 1.442695, %v877_v25  ;;  %898 = vrot.lane.b32.xlu2 %v2672_v49, %s2473_s21 }
 0x5c6   :  { %2389 = vpow2.f32 %v878_v26 }
 0x5cc   :  { %v2390_v33 = vpop.eup %2389  ;;  %958 = vrot.lane.b32.xlu2 %v2562_v0, %s2474_s22 }
 0x5cd   :  { %v880_v1 = vsel %vm209_vm1, %v2390_v33, 0.0 }
 0x5ce   :  { %881 = vadd.xlane.f32.xlu1 %v880_v1 }
 0x5d4   :  { %v821_v2 = vpop.permute.xlu0 %820 }
 0x5d5   :  { %841 = vmatpush.msrb.mxu3 %v821_v2 }
 0x5e7   :  { %514 = vrot.lane.b32.xlu1 %v2582_v4, %s2474_s22  ;;  %v925_v4 = vpop.permute.xlu0 %924 }
 0x5e8   :  { %948 = vmatpush.msra.mxu3 %v925_v4  ;;  %v2836_v4 = vld [vmem:[%s3207_s2] sm:$0xff] }
 0x5ef   :  { %v735_v3 = vpop.permute.xlu0 %734 }
 0x61f   :  { %v804_v27 = vpop.xlane.xlu2 %803 }
 0x620   :  { %2391 = vrcp.f32 %v804_v27  ;;  %v816_v35 = vand.u32 2147483648, %v804_v27  ;;  %v814_v38 = vand.u32 2147483647, %v804_v27  ;;  %vm810_vm13 = vweird.f32 %v804_v27 }
 0x622   :  { %v817_v39 = vor.u32 1.1754944e-38, %v816_v35  ;;  %vm815_vm15 = vcmp.eq.f32.partialorder %v814_v38, 8.507059e+37 }
 0x626   :  { %v2392_v30 = vpop.eup %2391 }
 0x627   :  { %v806_v31 = vmul.f32 %v2392_v30, %v804_v27  ;;  %v899_v32 = vpop.permute.xlu2 %898  ;;  %vm811_vm12 = vweird.f32 %v2392_v30 }
 0x628   :  { %919 = vmatpush.msra.mxu2 %v899_v32  ;;  %vm812_vm14 = vmor %vm810_vm13, %vm811_vm12  ;;  %vm1205_vm13 = vcmask 130048  }
 0x629   :  { %v807_v49 = vsub.f32 1.0, %v806_v31 }
 0x62b   :  { %v808_v37 = vmul.f32 %v2392_v30, %v807_v49 }
 0x62d   :  { %v809_v0 = vadd.f32 %v2392_v30, %v808_v37 }
 0x62f   :  { %v813_v40 = vsel %vm812_vm14, %v2392_v30, %v809_v0  ;;  %v959_v63 = vpop.permute.xlu2 %958 }
 0x630   :  { %v818_v29 = vsel %vm815_vm15, %v817_v39, %v813_v40 }
 0x631   :  { %v819_v41 = vmul.f32 %v2388_v22, %v818_v29 }
 0x633   :  { %2219 = vmatmul.msk.f32.vlgmr.msrb.gmra.mxu3 %vm209_vm1, %v819_v41 }
 0x641   :  { %v882_v42 = vpop.xlane.xlu1 %881 }
 0x642   :  { %2393 = vrcp.f32 %v882_v42  ;;  %v894_v45 = vand.u32 2147483648, %v882_v42  ;;  %v892_v47 = vand.u32 2147483647, %v882_v42  ;;  %vm888_vm3 = vweird.f32 %v882_v42 }
 0x644   :  { %v895_v50 = vor.u32 1.1754944e-38, %v894_v45  ;;  %vm893_vm5 = vcmp.eq.f32.partialorder %v892_v47, 8.507059e+37  ;;  %v59_v47 = vld [vmem:[%s3208_s3 + $0x8] sm:$0xff] }
 0x648   :  { %v2394_v34 = vpop.eup %2393 }
 0x649   :  { %v884_v43 = vmul.f32 %v2394_v34, %v882_v42  ;;  %vm889_vm2 = vweird.f32 %v2394_v34  ;;  %v58_v42 = vld [vmem:[%s3208_s3] sm:$0xff] }
 0x64a   :  { %vm890_vm4 = vmor %vm888_vm3, %vm889_vm2  ;;  %v1024_v45 = vadd.f32 %v58_v42, %v2836_v4 }
 0x64b   :  { %v885_v44 = vsub.f32 1.0, %v884_v43 }
 0x64d   :  { %v886_v46 = vmul.f32 %v2394_v34, %v885_v44 }
 0x64f   :  { %v887_v48 = vadd.f32 %v2394_v34, %v886_v46  ;;  %v2846_v46 = vld [vmem:[%s3207_s2 + $0x8] sm:$0xff] }
 0x651   :  { %v891_v51 = vsel %vm890_vm4, %v2394_v34, %v887_v48  ;;  %v1025_v48 = vadd.f32 %v59_v47, %v2846_v46 }
 0x652   :  { %v896_v52 = vsel %vm893_vm5, %v895_v50, %v891_v51  ;;  %v2856_v50 = vld [vmem:[%s3207_s2 + $0x10] sm:$0xff] }
 0x653   :  { %v897_v54 = vmul.f32 %v2390_v33, %v896_v52  ;;  %v60_v51 = vld [vmem:[%s3208_s3 + $0x10] sm:$0xff] }
 0x654   :  { %v1026_v52 = vadd.f32 %v60_v51, %v2856_v50 }
 0x655   :  { %2222 = vmatmul.msk.f32.vlgmr.msra.gmra.mxu2 %vm209_vm1, %v897_v54  ;;  %v2866_v54 = vld [vmem:[%s3207_s2 + $0x18] sm:$0xff] }
 0x659   :  { %v515_v55 = vpop.permute.xlu1 %514 }
 0x65a   :  { %538 = vmatpush.msra.mxu1 %v515_v55  ;;  %v61_v55 = vld [vmem:[%s3208_s3 + $0x18] sm:$0xff] }
 0x65b   :  { %2205 = vmatmul.msk.f32.vlgmr.msra.gmra.mxu1 %vm209_vm1, %v2741_v6 }
 0x65c   :  { %758 = vmatpush.msrb.mxu1 %v735_v3  ;;  %v1027_v3 = vadd.f32 %v61_v55, %v2866_v54 }
 0x663   :  { %2206 = vmatmul.msk.f32.gmra.mxu1 %vm209_vm1, %v2748_v15  ;;  %v2805_v15 = vld [vmem:[%s3211_s6] sm:$0xff] }
 0x66b   :  { %2215 = vmatmul.msk.f32.vlgmr.msrb.gmra.mxu1 %vm209_vm1, %v2750_v16 }
 0x673   :  { %2216 = vmatmul.msk.f32.gmra.mxu1 %vm209_vm1, %v2752_v17 }
 0x6b6   :  { %v843_v56 = vpop.f32.mrf.mxu3 }
 0x6b7   :  { %2223 = vmatmul.msk.f32.vlgmr.msra.gmra.mxu3 %vm209_vm1, %v843_v56 }
 0x6d8   :  { %v921_v57 = vpop.f32.mrf.mxu2  ;;  %v540_v58 = vpop.f32.mrf.mxu1 }
 0x6d9   :  { %2224 = vmatmul.msk.f32.gmra.mxu3 %vm209_vm1, %v921_v57  ;;  %v573_v53 = vadd.f32 %v2743_v36, %v540_v58  ;;  %v2793_v36 = vld [vmem:[%s3211_s6 + $0x10] sm:$0xff]  ;;  %v2877_v58 = vld [vmem:[%s3212_s7] ss:$0 sm:$0xff] }
 0x6da   :  { %1050 = vmatpush.msrb.mxu0 %v2793_v36  ;;  %v2810_v16 = vpack.i.bf16 %v2793_v36, %v2787_v14 }
 0x6e0   :  { %v543_v59 = vpop.f32.mrf.mxu1 }
 0x6e1   :  { %v576_v18 = vadd.f32 %v2745_v9, %v543_v59  ;;  %v2475_v9 = vmov 32.0  }
 0x6e2   :  { %2395 = vrcp.f32 %v2475_v9 }
 0x6e8   :  { %v760_v60 = vpop.f32.mrf.mxu1  ;;  %v2396_v25 = vpop.eup %2395 }
 0x6e9   :  { %v766_v61 = vadd.f32 %v760_v60, %v573_v53  ;;  %v972_v26 = vmul.f32 32.0, %v2396_v25  ;;  %vm976_vm6 = vweird.f32 %v2396_v25 }
 0x6eb   :  { %v973_v33 = vsub.f32 1.0, %v972_v26 }
 0x6ed   :  { %v974_v1 = vmul.f32 %v2396_v25, %v973_v33 }
 0x6ef   :  { %v975_v2 = vadd.f32 %v2396_v25, %v974_v1 }
 0x6f0   :  { %v763_v17 = vpop.f32.mrf.mxu1 }
 0x6f1   :  { %v767_v19 = vadd.f32 %v763_v17, %v576_v18  ;;  %v2823_v27 = vsel %vm976_vm6, %v2396_v25, %v975_v2 }
 0x73a   :  { %v950_v62 = vpop.f32.mrf.mxu3 }
 0x73b   :  { %v956_v28 = vadd.f32 %v950_v62, %v766_v61 }
 0x73d   :  { %v961_v5 = vadd.f32 %v959_v63, %v956_v28 }
 0x73f   :  { %v963_v6 = vadd.f32 %v961_v5, %v2603_v7  ;;  %v2799_v7 = vld [vmem:[%s3211_s6 + $0x8] sm:$0xff]  ;;  %v2889_v5 = vld [vmem:[%s3218_s13] sm:$0x7] }
 0x740   :  { %1051 = vmatpush.msrb.mxu0 %v2799_v7  ;;  %v2819_v24 = vpack.i.bf16 %v2805_v15, %v2799_v7  ;;  %v1019_v18 = vperm.slane %v2889_v5, 0 }
 0x741   :  { %v965_v12 = vsel %vm93_vm0, %v963_v6, 0.0 }
 0x742   :  { %966 = vadd.xlane.f32.xlu1 %v965_v12  ;;  %1052 = vmatpush.msrb.mxu0 %v2805_v15 }
 0x75b   :  { %2310 = vrot.lane.b32.xlu1 %v2810_v16, %s2469_s5 }
 0x75c   :  { %v953_v13 = vpop.f32.mrf.mxu3 }
 0x75d   :  { %v957_v20 = vadd.f32 %v953_v13, %v767_v19 }
 0x75f   :  { %v962_v21 = vadd.f32 %v959_v63, %v957_v20  ;;  %v2884_v63 = vld [vmem:[%s3217_s12] sm:$0x7] }
 0x760   :  { %v1016_v12 = vperm.slane %v2884_v63, 0 }
 0x761   :  { %v964_v22 = vadd.f32 %v962_v21, %v2616_v10 }
 0x763   :  { %v968_v23 = vsel %vm93_vm0, %v964_v22, 0.0  ;;  %2325 = vrot.lane.b32.xlu1 %v2819_v24, %s2470_s28 }
 0x764   :  { %969 = vadd.xlane.f32.xlu0 %v968_v23 }
 0x778   :  { %2315 = vrot.lane.b32.xlu0 %v2819_v24, %s2469_s5 }
 0x780   :  { %2320 = vrot.lane.b32.xlu0 %v2810_v16, %s2470_s28 }
 0x7b5   :  { %v967_v10 = vpop.xlane.xlu1 %966 }
 0x7b6   :  { %v978_v30 = vmul.f32 %v2823_v27, %v967_v10 }
 0x7b8   :  { %v980_v31 = vsub.f32 %v963_v6, %v978_v30 }
 0x7ba   :  { %v982_v32 = vmul.f32 %v980_v31, %v980_v31 }
 0x7bc   :  { %v984_v49 = vsel %vm93_vm0, %v982_v32, 0.0 }
 0x7bd   :  { %985 = vadd.xlane.f32.xlu2 %v984_v49 }
 0x7cd   :  { %v2311_v35 = vpop.permute.xlu1 %2310 }
 0x7ce   :  { %v2313_v37 = vunpack.i.h.bf16 %v2311_v35  ;;  %v2312_v38 = vunpack.i.l.bf16 %v2311_v35 }
 0x7d0   :  { %1103 = vmatpush.msra.mxu1 %v2312_v38 }
 0x7d2   :  { %1104 = vmatpush.msra.mxu1 %v2313_v37 }
 0x7d7   :  { %v970_v0 = vpop.xlane.xlu0 %969 }
 0x7d8   :  { %v979_v39 = vmul.f32 %v2823_v27, %v970_v0 }
 0x7da   :  { %v2828_v40 = vsub.f32 %v964_v22, %v979_v39 }
 0x7dc   :  { %v983_v29 = vmul.f32 %v2828_v40, %v2828_v40 }
 0x7de   :  { %v987_v41 = vsel %vm93_vm0, %v983_v29, 0.0 }
 0x7df   :  { %988 = vadd.xlane.f32.xlu2 %v987_v41 }
 0x7ea   :  { %v2316_v34 = vpop.permute.xlu0 %2315 }
 0x7eb   :  { %v2318_v43 = vunpack.i.h.bf16 %v2316_v34  ;;  %v2317_v44 = vunpack.i.l.bf16 %v2316_v34 }
 0x7ed   :  { %1105 = vmatpush.msra.mxu1 %v2317_v44  ;;  %v2326_v44 = vpop.permute.xlu1 %2325 }
 0x7ee   :  { %v2328_v47 = vunpack.i.h.bf16 %v2326_v44 }
 0x7ef   :  { %1106 = vmatpush.msra.mxu1 %v2318_v43 }
 0x7f0   :  { %2227 = vmatmul.msk.f32.vlgmr.msra.gmra.mxu1 %vm93_vm0, %v1024_v45  ;;  %v2327_v45 = vunpack.i.l.bf16 %v2326_v44 }
 0x7f2   :  { %v2321_v42 = vpop.permute.xlu0 %2320 }
 0x7f3   :  { %v2323_v34 = vunpack.i.h.bf16 %v2321_v42  ;;  %v2322_v43 = vunpack.i.l.bf16 %v2321_v42 }
 0x7f5   :  { %1159 = vmatpush.msrb.mxu2 %v2322_v43 }
 0x7f7   :  { %1076 = vrot.lane.b32.xlu2 %v2877_v58, %s2469_s5  ;;  %1160 = vmatpush.msrb.mxu2 %v2323_v34 }
 0x7f8   :  { %2228 = vmatmul.msk.f32.gmra.mxu1 %vm93_vm0, %v1025_v48 }
 0x7f9   :  { %1161 = vmatpush.msrb.mxu2 %v2327_v45 }
 0x7fb   :  { %1162 = vmatpush.msrb.mxu2 %v2328_v47 }
 0x7fc   :  { %2231 = vmatmul.msk.f32.vlgmr.msrb.gmra.mxu2 %vm93_vm0, %v2836_v4 }
 0x800   :  { %2229 = vmatmul.msk.f32.gmra.mxu1 %vm93_vm0, %v1026_v52 }
 0x804   :  { %2232 = vmatmul.msk.f32.gmra.mxu2 %vm93_vm0, %v2846_v46 }
 0x808   :  { %2230 = vmatmul.msk.f32.gmra.mxu1 %vm93_vm0, %v1027_v3 }
 0x80c   :  { %2233 = vmatmul.msk.f32.gmra.mxu2 %vm93_vm0, %v2856_v50 }
 0x814   :  { %2234 = vmatmul.msk.f32.gmra.mxu2 %vm93_vm0, %v2866_v54 }
 0x830   :  { %v986_v56 = vpop.xlane.xlu2 %985 }
 0x831   :  { %v990_v57 = vmul.f32 %v986_v56, %v2823_v27 }
 0x833   :  { %v992_v59 = vadd.f32 1e-05, %v990_v57 }
 0x835   :  { %2397 = vrsqrt.f32 %v992_v59  ;;  %vm1000_vm8 = vweird.f32 %v992_v59 }
 0x83b   :  { %v2398_v60 = vpop.eup %2397 }
 0x83c   :  { %v995_v53 = vmul.f32 %v2398_v60, %v992_v59  ;;  %vm1001_vm7 = vweird.f32 %v2398_v60 }
 0x83d   :  { %vm1002_vm9 = vmor %vm1000_vm8, %vm1001_vm7 }
 0x83e   :  { %v996_v61 = vmul.f32 %v2398_v60, %v995_v53 }
 0x840   :  { %v997_v62 = vmul.f32 0.5, %v996_v61 }
 0x842   :  { %v998_v28 = vsub.f32 1.5, %v997_v62 }
 0x844   :  { %v999_v6 = vmul.f32 %v2398_v60, %v998_v28 }
 0x846   :  { %v1003_v17 = vsel %vm1002_vm9, %v2398_v60, %v999_v6 }
 0x847   :  { %v1014_v19 = vmul.f32 %v1003_v17, %v980_v31 }
 0x849   :  { %v1017_v13 = vmul.f32 %v1016_v12, %v1014_v19 }
 0x84b   :  { %v2893_v20 = vadd.f32 %v1019_v18, %v1017_v13 }
 0x84d   :  { %v1022_v21 = vadd.f32 %v2893_v20, %v2608_v8 }
 0x84f   :  { %2225 = vmatmul.msk.f32.vlgmr.msrb.gmra.mxu0 %vm93_vm0, %v1022_v21 }
 0x852   :  { %v989_v22 = vpop.xlane.xlu2 %988 }
 0x853   :  { %v991_v23 = vmul.f32 %v989_v22, %v2823_v27 }
 0x855   :  { %v993_v9 = vadd.f32 1e-05, %v991_v23 }
 0x857   :  { %2399 = vrsqrt.f32 %v993_v9  ;;  %vm1010_vm11 = vweird.f32 %v993_v9 }
 0x85a   :  { %v1077_v49 = vpop.permute.xlu2 %1076 }
 0x85d   :  { %v2400_v25 = vpop.eup %2399 }
 0x85e   :  { %v1005_v26 = vmul.f32 %v2400_v25, %v993_v9  ;;  %vm1011_vm10 = vweird.f32 %v2400_v25 }
 0x85f   :  { %vm1012_vm12 = vmor %vm1010_vm11, %vm1011_vm10 }
 0x860   :  { %v1006_v33 = vmul.f32 %v2400_v25, %v1005_v26 }
 0x862   :  { %v1007_v1 = vmul.f32 0.5, %v1006_v33 }
 0x864   :  { %v1008_v2 = vsub.f32 1.5, %v1007_v1 }
 0x866   :  { %v1009_v8 = vmul.f32 %v2400_v25, %v1008_v2 }
 0x868   :  { %v1013_v10 = vsel %vm1012_vm12, %v2400_v25, %v1009_v8 }
 0x869   :  { %v1015_v30 = vmul.f32 %v1013_v10, %v2828_v40 }
 0x86b   :  { %v1018_v31 = vmul.f32 %v1016_v12, %v1015_v30 }
 0x86d   :  { %v2904_v32 = vadd.f32 %v1019_v18, %v1018_v31  ;;  %v1108_v24 = vpop.f32.mrf.mxu1 }
 0x86e   :  { %v2909_v37 = vadd.f32 %v1108_v24, %v1077_v49 }
 0x86f   :  { %v1023_v16 = vadd.f32 %v2904_v32, %v2621_v11 }
 0x870   :  { %1333 = vrot.lane.b32.xlu1 %v2909_v37, %s2471_s0 }
 0x871   :  { %2226 = vmatmul.msk.f32.gmra.mxu0 %vm93_vm0, %v1023_v16 }
 0x875   :  { %v1111_v35 = vpop.f32.mrf.mxu1 }
 0x876   :  { %v2911_v38 = vadd.f32 %v1111_v35, %v1077_v49 }
 0x878   :  { %1335 = vrot.lane.b32.xlu0 %v2911_v38, %s2471_s0  ;;  %2235 = vmatpush.xpose.msk.msrb.mxu3 %vm209_vm1, %v2911_v38 }
 0x87c   :  { %2236 = vmatpush.xpose.msk.msrb.mxu3 %vm209_vm1, %v2909_v37 }
 0x87d   :  { %v1114_v11 = vpop.f32.mrf.mxu1 }
 0x87e   :  { %v2921_v0 = vadd.f32 %v1114_v11, %v1077_v49 }
 0x87f   :  { %v1164_v26 = vpop.f32.mrf.mxu2 }
 0x880   :  { %1421 = vrot.lane.b32.xlu1 %v2921_v0, %s2471_s0 }
 0x885   :  { %v1117_v39 = vpop.f32.mrf.mxu1 }
 0x886   :  { %v2925_v40 = vadd.f32 %v1117_v39, %v1077_v49 }
 0x887   :  { %v1167_v8 = vpop.f32.mrf.mxu2 }
 0x888   :  { %1423 = vrot.lane.b32.xlu0 %v2925_v40, %s2471_s0  ;;  %1573 = vrot.lane.b32.xlu1 %v2909_v37, %s2472_s1 }
 0x889   :  { %2239 = vmatpush.xpose.msk.msra.mxu3 %vm209_vm1, %v2925_v40 }
 0x88d   :  { %2240 = vmatpush.xpose.msk.msra.mxu3 %vm209_vm1, %v2921_v0 }
 0x88f   :  { %v1170_v31 = vpop.f32.mrf.mxu2 }
 0x890   :  { %1575 = vrot.lane.b32.xlu0 %v2911_v38, %s2472_s1  ;;  %1659 = vrot.lane.b32.xlu1 %v2921_v0, %s2472_s1 }
 0x897   :  { %v1173_v39 = vpop.f32.mrf.mxu2 }
 0x898   :  { %1661 = vrot.lane.b32.xlu0 %v2925_v40, %s2472_s1 }
 0x8cc   :  { %v1054_v29 = vpop.f32.mrf.mxu0 }
 0x8cd   :  { %v2942_v41 = vadd.f32 %v2877_v58, %v1054_v29 }
 0x8cf   :  { %1331 = vrot.lane.b32.xlu2 %v2942_v41, %s2471_s0  ;;  %2237 = vmatmul.msk.f32.vlgmr.msrb.gmra.mxu3 %vm209_vm1, %v2942_v41 }
 0x8e2   :  { %v1334_v52 = vpop.permute.xlu1 %1333 }
 0x8ea   :  { %v1336_v4 = vpop.permute.xlu0 %1335 }
 0x8eb   :  { %2243 = vmatpush.xpose.msk.msrb.mxu3 %vm209_vm1, %v1336_v4 }
 0x8ee   :  { %v1057_v48 = vpop.f32.mrf.mxu0 }
 0x8ef   :  { %v2951_v51 = vadd.f32 %v2877_v58, %v1057_v48  ;;  %2244 = vmatpush.xpose.msk.msrb.mxu3 %vm209_vm1, %v1334_v52 }
 0x8f1   :  { %1419 = vrot.lane.b32.xlu2 %v2951_v51, %s2471_s0  ;;  %2241 = vmatmul.msk.f32.vlgmr.msra.gmra.mxu3 %vm209_vm1, %v2951_v51 }
 0x8f2   :  { %v1422_v46 = vpop.permute.xlu1 %1421 }
 0x8f9   :  { %1571 = vrot.lane.b32.xlu2 %v2942_v41, %s2472_s1 }
 0x8fa   :  { %v1424_v55 = vpop.permute.xlu0 %1423  ;;  %v1574_v50 = vpop.permute.xlu1 %1573 }
 0x8fb   :  { %2247 = vmatpush.xpose.msk.msrb.mxu1 %vm209_vm1, %v1424_v55 }
 0x8ff   :  { %2248 = vmatpush.xpose.msk.msrb.mxu1 %vm209_vm1, %v1422_v46 }
 0x901   :  { %1657 = vrot.lane.b32.xlu2 %v2951_v51, %s2472_s1 }
 0x902   :  { %v1576_v3 = vpop.permute.xlu0 %1575  ;;  %v1660_v59 = vpop.permute.xlu1 %1659 }
 0x903   :  { %2255 = vmatpush.xpose.msk.msra.mxu1 %vm209_vm1, %v1576_v3 }
 0x907   :  { %2256 = vmatpush.xpose.msk.msra.mxu1 %vm209_vm1, %v1574_v50 }
 0x90a   :  { %v1662_v54 = vpop.permute.xlu0 %1661 }
 0x929   :  { %v1332_v56 = vpop.permute.xlu2 %1331 }
 0x92a   :  { %2245 = vmatmul.msk.f32.vlgmr.msrb.gmra.mxu3 %vm209_vm1, %v1332_v56 }
 0x94b   :  { %v1420_v57 = vpop.permute.xlu2 %1419 }
 0x94c   :  { %2249 = vmatmul.msk.f32.vlgmr.msrb.gmra.mxu1 %vm209_vm1, %v1420_v57 }
 0x94d   :  { %2259 = vmatpush.xpose.msk.msrb.mxu1 %vm209_vm1, %v1662_v54 }
 0x951   :  { %2260 = vmatpush.xpose.msk.msrb.mxu1 %vm209_vm1, %v1660_v59 }
 0x952   :  { %v1202_v60 = vpop.f32.mrf.mxu3 }
 0x953   :  { %v1572_v53 = vpop.permute.xlu2 %1571  ;;  %v1206_v61 = vsel %vm1205_vm13, %v1202_v60, -inf }
 0x954   :  { %2257 = vmatmul.msk.f32.vlgmr.msra.gmra.mxu1 %vm209_vm1, %v1572_v53  ;;  %1207 = vmax.xlane.f32.xlu0 %v1206_v61 }
 0x95b   :  { %v1658_v62 = vpop.permute.xlu2 %1657 }
 0x95c   :  { %2261 = vmatmul.msk.f32.vlgmr.msrb.gmra.mxu1 %vm209_vm1, %v1658_v62 }
 0x974   :  { %v1280_v28 = vpop.f32.mrf.mxu3 }
 0x975   :  { %v1283_v6 = vsel %vm1205_vm13, %v1280_v28, -inf }
 0x976   :  { %1284 = vmax.xlane.f32.xlu1 %v1283_v6 }
 0x98f   :  { %1132 = vrot.lane.b32.xlu1 %v2877_v58, %s2470_s28 }
 0x9ad   :  { %v1360_v22 = vpop.f32.mrf.mxu3 }
 0x9ae   :  { %v1363_v23 = vsel %vm1205_vm13, %v1360_v22, -inf }
 0x9c7   :  { %v1208_v12 = vpop.xlane.xlu0 %1207 }
 0x9c8   :  { %v1209_v17 = vsub.f32 %v1202_v60, %v1208_v12 }
 0x9c9   :  { %v2987_v21 = vpop.f32.mrf.mxu1 }
 0x9ca   :  { %v1210_v18 = vmul.f32 1.442695, %v1209_v17  ;;  %v1451_v16 = vsel %vm1205_vm13, %v2987_v21, -inf }
 0x9cc   :  { %2401 = vpow2.f32 %v1210_v18 }
 0x9d1   :  { %v1600_v9 = vpop.f32.mrf.mxu1 }
 0x9d2   :  { %v2983_v19 = vpop.eup %2401  ;;  %v1603_v25 = vsel %vm1205_vm13, %v1600_v9, -inf }
 0x9d3   :  { %v1212_v13 = vsel %vm1205_vm13, %v2983_v19, 0.0 }
 0x9d4   :  { %1213 = vadd.xlane.f32.xlu2 %v1212_v13 }
 0x9d9   :  { %v2997_v49 = vpop.f32.mrf.mxu1 }
 0x9da   :  { %v1689_v42 = vsel %vm1205_vm13, %v2997_v49, -inf }
 0x9dc   :  { %1364 = vmax.xlane.f32.xlu2 %v1363_v23 }
 0x9e4   :  { %1604 = vmax.xlane.f32.xlu2 %v1603_v25 }
 0x9e9   :  { %v1285_v33 = vpop.xlane.xlu1 %1284 }
 0x9ea   :  { %v1286_v1 = vsub.f32 %v1280_v28, %v1285_v33 }
 0x9ec   :  { %v1287_v2 = vmul.f32 1.442695, %v1286_v1 }
 0x9ee   :  { %2403 = vpow2.f32 %v1287_v2 }
 0x9f4   :  { %v2991_v10 = vpop.eup %2403 }
 0x9f5   :  { %v1289_v30 = vsel %vm1205_vm13, %v2991_v10, 0.0 }
 0x9f6   :  { %1290 = vadd.xlane.f32.xlu0 %v1289_v30 }
 0x9fe   :  { %1452 = vmax.xlane.f32.xlu0 %v1451_v16 }
 0xa01   :  { %v1133_v24 = vpop.permute.xlu1 %1132 }
 0xa02   :  { %v1165_v35 = vadd.f32 %v1164_v26, %v1133_v24  ;;  %v1168_v11 = vadd.f32 %v1167_v8, %v1133_v24  ;;  %v1174_v34 = vadd.f32 %v1173_v39, %v1133_v24  ;;  %v1171_v43 = vadd.f32 %v1170_v31, %v1133_v24 }
 0xa04   :  { %v2999_v29 = vpack.i.bf16 %v1165_v35, %v1168_v11  ;;  %1248 = vmatpush.msra.mxu0 %v1168_v11  ;;  %v3009_v44 = vpack.i.bf16 %v1171_v43, %v1174_v34 }
 0xa06   :  { %1690 = vmax.xlane.f32.xlu0 %v1689_v42  ;;  %2330 = vrot.lane.b32.xlu2 %v2999_v29, %s2471_s0 }
 0xa07   :  { %1249 = vmatpush.msra.mxu0 %v1165_v35 }
 0xa09   :  { %1325 = vmatpush.msrb.mxu0 %v1174_v34 }
 0xa0b   :  { %1326 = vmatpush.msrb.mxu0 %v1171_v43 }
 0xa0e   :  { %1539 = vrot.lane.b32.xlu2 %v2805_v15, %s2474_s22 }
 0xa16   :  { %2340 = vrot.lane.b32.xlu2 %v2999_v29, %s2472_s1 }
 0xa1a   :  { %2335 = vrot.lane.b32.xlu0 %v3009_v44, %s2471_s0 }
 0xa1e   :  { %1781 = vrot.lane.b32.xlu2 %v2911_v38, %s2473_s21 }
 0xa22   :  { %2345 = vrot.lane.b32.xlu0 %v3009_v44, %s2472_s1 }
 0xa2a   :  { %1867 = vrot.lane.b32.xlu0 %v2925_v40, %s2473_s21 }
 0xa47   :  { %v1214_v45 = vpop.xlane.xlu2 %1213 }
 0xa48   :  { %2405 = vrcp.f32 %v1214_v45  ;;  %v1226_v55 = vand.u32 2147483648, %v1214_v45  ;;  %v1224_v50 = vand.u32 2147483647, %v1214_v45  ;;  %vm1220_vm15 = vweird.f32 %v1214_v45 }
 0xa4a   :  { %v1227_v56 = vor.u32 1.1754944e-38, %v1226_v55  ;;  %vm1225_vm3 = vcmp.eq.f32.partialorder %v1224_v50, 8.507059e+37 }
 0xa4e   :  { %v2406_v15 = vpop.eup %2405 }
 0xa4f   :  { %v1216_v47 = vmul.f32 %v2406_v15, %v1214_v45  ;;  %v1365_v48 = vpop.xlane.xlu2 %1364  ;;  %vm1221_vm14 = vweird.f32 %v2406_v15 }
 0xa50   :  { %v1366_v4 = vsub.f32 %v1360_v22, %v1365_v48  ;;  %vm1222_vm2 = vmor %vm1220_vm15, %vm1221_vm14 }
 0xa51   :  { %v1217_v52 = vsub.f32 1.0, %v1216_v47 }
 0xa52   :  { %v1367_v46 = vmul.f32 1.442695, %v1366_v4 }
 0xa53   :  { %v1218_v3 = vmul.f32 %v2406_v15, %v1217_v52 }
 0xa54   :  { %2407 = vpow2.f32 %v1367_v46 }
 0xa55   :  { %v1219_v38 = vadd.f32 %v2406_v15, %v1218_v3 }
 0xa57   :  { %v1223_v54 = vsel %vm1222_vm2, %v2406_v15, %v1219_v38  ;;  %v1605_v40 = vpop.xlane.xlu2 %1604 }
 0xa58   :  { %v1228_v57 = vsel %vm1225_vm3, %v1227_v56, %v1223_v54  ;;  %v1606_v59 = vsub.f32 %v1600_v9, %v1605_v40 }
 0xa59   :  { %v3020_v60 = vmul.f32 %v2983_v19, %v1228_v57 }
 0xa5a   :  { %v3022_v53 = vpop.eup %2407  ;;  %v1607_v61 = vmul.f32 1.442695, %v1606_v59 }
 0xa5b   :  { %2238 = vmatmul.msk.f32.vlgmr.msra.gmra.mxu0 %vm1205_vm13, %v3020_v60  ;;  %v1369_v62 = vsel %vm1205_vm13, %v3022_v53, 0.0 }
 0xa5c   :  { %2409 = vpow2.f32 %v1607_v61  ;;  %1370 = vadd.xlane.f32.xlu2 %v1369_v62 }
 0xa60   :  { %v2331_v28 = vpop.permute.xlu2 %2330 }
 0xa61   :  { %v2333_v6 = vunpack.i.h.bf16 %v2331_v28  ;;  %v2332_v12 = vunpack.i.l.bf16 %v2331_v28 }
 0xa62   :  { %v3028_v17 = vpop.eup %2409 }
 0xa63   :  { %v1609_v18 = vsel %vm1205_vm13, %v3028_v17, 0.0  ;;  %1413 = vmatpush.msra.mxu0 %v2332_v12 }
 0xa64   :  { %1610 = vadd.xlane.f32.xlu1 %v1609_v18 }
 0xa65   :  { %1414 = vmatpush.msra.mxu0 %v2333_v6 }
 0xa68   :  { %v1540_v39 = vpop.permute.xlu2 %1539 }
 0xa69   :  { %v1291_v19 = vpop.xlane.xlu0 %1290 }
 0xa6a   :  { %2411 = vrcp.f32 %v1291_v19  ;;  %v1303_v26 = vand.u32 2147483648, %v1291_v19  ;;  %v1301_v2 = vand.u32 2147483647, %v1291_v19  ;;  %vm1297_vm5 = vweird.f32 %v1291_v19 }
 0xa6c   :  { %v1304_v30 = vor.u32 1.1754944e-38, %v1303_v26  ;;  %vm1302_vm7 = vcmp.eq.f32.partialorder %v1301_v2, 8.507059e+37 }
 0xa70   :  { %v2412_v13 = vpop.eup %2411  ;;  %v2341_v45 = vpop.permute.xlu2 %2340 }
 0xa71   :  { %v1293_v22 = vmul.f32 %v2412_v13, %v1291_v19  ;;  %v1453_v23 = vpop.xlane.xlu0 %1452  ;;  %vm1298_vm4 = vweird.f32 %v2412_v13  ;;  %v2343_v15 = vunpack.i.h.bf16 %v2341_v45 }
 0xa72   :  { %v1454_v9 = vsub.f32 %v2987_v21, %v1453_v23  ;;  %vm1299_vm6 = vmor %vm1297_vm5, %vm1298_vm4 }
 0xa73   :  { %v1294_v25 = vsub.f32 1.0, %v1293_v22 }
 0xa74   :  { %v1455_v33 = vmul.f32 1.442695, %v1454_v9  ;;  %1865 = vrot.lane.b32.xlu2 %v2921_v0, %s2473_s21 }
 0xa75   :  { %v1295_v1 = vmul.f32 %v2412_v13, %v1294_v25 }
 0xa76   :  { %2413 = vpow2.f32 %v1455_v33 }
 0xa77   :  { %v1296_v8 = vadd.f32 %v2412_v13, %v1295_v1 }
 0xa78   :  { %v1782_v47 = vpop.permute.xlu2 %1781 }
 0xa79   :  { %v1300_v31 = vsel %vm1299_vm6, %v2412_v13, %v1296_v8  ;;  %v1691_v16 = vpop.xlane.xlu0 %1690 }
 0xa7a   :  { %v1305_v24 = vsel %vm1302_vm7, %v1304_v30, %v1300_v31  ;;  %v1692_v21 = vsub.f32 %v2997_v49, %v1691_v16 }
 0xa7b   :  { %v3037_v35 = vmul.f32 %v2991_v10, %v1305_v24 }
 0xa7c   :  { %v3039_v11 = vpop.eup %2413  ;;  %v1693_v0 = vmul.f32 1.442695, %v1692_v21  ;;  %1863 = vrot.lane.b32.xlu2 %v2951_v51, %s2473_s21 }
 0xa7d   :  { %1779 = vrot.lane.b32.xlu1 %v2909_v37, %s2473_s21  ;;  %2242 = vmatmul.msk.f32.vlgmr.msrb.gmra.mxu0 %vm1205_vm13, %v3037_v35  ;;  %v1457_v42 = vsel %vm1205_vm13, %v3039_v11, 0.0  ;;  %v2342_v37 = vunpack.i.l.bf16 %v2341_v45 }
 0xa7e   :  { %2415 = vpow2.f32 %v1693_v0  ;;  %1458 = vadd.xlane.f32.xlu0 %v1457_v42  ;;  %1563 = vmatpush.msrb.mxu0 %v1540_v39 }
 0xa84   :  { %v3049_v10 = vpop.eup %2415 }
 0xa85   :  { %v1695_v49 = vsel %vm1205_vm13, %v3049_v10, 0.0 }
 0xa86   :  { %1696 = vadd.xlane.f32.xlu0 %v1695_v49 }
 0xa8c   :  { %v2336_v51 = vpop.permute.xlu0 %2335 }
 0xa8d   :  { %v2338_v34 = vunpack.i.h.bf16 %v2336_v51  ;;  %v2337_v43 = vunpack.i.l.bf16 %v2336_v51 }
 0xa8f   :  { %1501 = vmatpush.msra.mxu2 %v2337_v43 }
 0xa91   :  { %1502 = vmatpush.msra.mxu2 %v2338_v34 }
 0xa93   :  { %1651 = vmatpush.msrb.mxu2 %v2342_v37 }
 0xa94   :  { %v3055_v57 = vpop.permute.xlu0 %2345 }
 0xa95   :  { %1652 = vmatpush.msrb.mxu2 %v2343_v15  ;;  %v2347_v37 = vunpack.i.l.bf16 %v3055_v57 }
 0xa9a   :  { %1777 = vrot.lane.b32.xlu0 %v2942_v41, %s2473_s21 }
 0xa9c   :  { %v1868_v9 = vpop.permute.xlu0 %1867 }
 0xacf   :  { %v1371_v48 = vpop.xlane.xlu2 %1370 }
 0xad0   :  { %2417 = vrcp.f32 %v1371_v48  ;;  %v1383_v3 = vand.u32 2147483648, %v1371_v48  ;;  %v1381_v38 = vand.u32 2147483647, %v1371_v48  ;;  %vm1377_vm9 = vweird.f32 %v1371_v48 }
 0xad2   :  { %v1384_v40 = vor.u32 1.1754944e-38, %v1383_v3  ;;  %vm1382_vm11 = vcmp.eq.f32.partialorder %v1381_v38, 8.507059e+37 }
 0xad6   :  { %v2418_v4 = vpop.eup %2417 }
 0xad7   :  { %v1373_v52 = vmul.f32 %v2418_v4, %v1371_v48  ;;  %v1611_v55 = vpop.xlane.xlu1 %1610  ;;  %vm1378_vm8 = vweird.f32 %v2418_v4 }
 0xad8   :  { %2419 = vrcp.f32 %v1611_v55  ;;  %vm1379_vm10 = vmor %vm1377_vm9, %vm1378_vm8  ;;  %v1623_v6 = vand.u32 2147483648, %v1611_v55  ;;  %v1621_v18 = vand.u32 2147483647, %v1611_v55  ;;  %vm1617_vm14 = vweird.f32 %v1611_v55  ;;  %v1251_v26 = vpop.f32.mrf.mxu0 }
 0xad9   :  { %v1374_v46 = vsub.f32 1.0, %v1373_v52 }
 0xada   :  { %v1624_v13 = vor.u32 1.1754944e-38, %v1623_v6  ;;  %vm1622_vm2 = vcmp.eq.f32.partialorder %v1621_v18, 8.507059e+37 }
 0xadb   :  { %v1375_v50 = vmul.f32 %v2418_v4, %v1374_v46 }
 0xadd   :  { %v1376_v56 = vadd.f32 %v2418_v4, %v1375_v50 }
 0xade   :  { %v2420_v54 = vpop.eup %2419 }
 0xadf   :  { %v1380_v41 = vsel %vm1379_vm10, %v2418_v4, %v1376_v56  ;;  %v1613_v59 = vmul.f32 %v2420_v54, %v1611_v55  ;;  %vm1618_vm12 = vweird.f32 %v2420_v54  ;;  %v2348_v4 = vunpack.i.h.bf16 %v3055_v57 }
 0xae0   :  { %v1385_v61 = vsel %vm1382_vm11, %v1384_v40, %v1380_v41  ;;  %vm1619_vm15 = vmor %vm1617_vm14, %vm1618_vm12 }
 0xae1   :  { %v1614_v62 = vsub.f32 1.0, %v1613_v59  ;;  %v1386_v28 = vmul.f32 %v3022_v53, %v1385_v61 }
 0xae3   :  { %v1615_v12 = vmul.f32 %v2420_v54, %v1614_v62  ;;  %2246 = vmatmul.msk.f32.vlgmr.msra.gmra.mxu0 %vm1205_vm13, %v1386_v28  ;;  %v1387_v25 = vadd.f32 %v1386_v28, %v3020_v60 }
 0xae4   :  { %2265 = vmatpush.xpose.msk.msra.mxu0 %vm209_vm1, %v1782_v47 }
 0xae5   :  { %v1616_v19 = vadd.f32 %v2420_v54, %v1615_v12 }
 0xae7   :  { %v1620_v22 = vsel %vm1619_vm15, %v2420_v54, %v1616_v19  ;;  %v1866_v54 = vpop.permute.xlu2 %1865 }
 0xae8   :  { %v1625_v23 = vsel %vm1622_vm2, %v1624_v13, %v1620_v22 }
 0xae9   :  { %v1626_v53 = vmul.f32 %v3028_v17, %v1625_v23 }
 0xaeb   :  { %2253 = vmatmul.msk.f32.vlgmr.msrb.gmra.mxu0 %vm209_vm1, %v1251_v26  ;;  %v3063_v33 = vadd.f32 %v1626_v53, %v1387_v25 }
 0xaef   :  { %v1780_v1 = vpop.permute.xlu1 %1779  ;;  %v1864_v40 = vpop.permute.xlu2 %1863 }
 0xaf0   :  { %2266 = vmatpush.xpose.msk.msra.mxu0 %vm209_vm1, %v1780_v1 }
 0xaf1   :  { %v1459_v2 = vpop.xlane.xlu0 %1458 }
 0xaf2   :  { %2421 = vrcp.f32 %v1459_v2  ;;  %v1471_v60 = vand.u32 2147483648, %v1459_v2  ;;  %v1469_v21 = vand.u32 2147483647, %v1459_v2  ;;  %vm1465_vm4 = vweird.f32 %v1459_v2 }
 0xaf4   :  { %v1472_v42 = vor.u32 1.1754944e-38, %v1471_v60  ;;  %vm1470_vm6 = vcmp.eq.f32.partialorder %v1469_v21, 8.507059e+37 }
 0xaf8   :  { %v2422_v8 = vpop.eup %2421 }
 0xaf9   :  { %v1461_v30 = vmul.f32 %v2422_v8, %v1459_v2  ;;  %v1697_v31 = vpop.xlane.xlu0 %1696  ;;  %vm1466_vm3 = vweird.f32 %v2422_v8 }
 0xafa   :  { %2423 = vrcp.f32 %v1697_v31  ;;  %v1328_v16 = vpop.f32.mrf.mxu0  ;;  %vm1467_vm5 = vmor %vm1465_vm4, %vm1466_vm3  ;;  %v1709_v15 = vand.u32 2147483648, %v1697_v31  ;;  %v1707_v48 = vand.u32 2147483647, %v1697_v31  ;;  %vm1703_vm8 = vweird.f32 %v1697_v31 }
 0xafb   :  { %v1462_v24 = vsub.f32 1.0, %v1461_v30  ;;  %2254 = vmatmul.msk.f32.gmra.mxu0 %vm209_vm1, %v1328_v16 }
 0xafc   :  { %v1710_v55 = vor.u32 1.1754944e-38, %v1709_v15  ;;  %vm1708_vm10 = vcmp.eq.f32.partialorder %v1707_v48, 8.507059e+37 }
 0xafd   :  { %v1463_v17 = vmul.f32 %v2422_v8, %v1462_v24 }
 0xaff   :  { %v1464_v0 = vadd.f32 %v2422_v8, %v1463_v17 }
 0xb00   :  { %v2424_v39 = vpop.eup %2423 }
 0xb01   :  { %v1468_v49 = vsel %vm1467_vm5, %v2422_v8, %v1464_v0  ;;  %v1699_v51 = vmul.f32 %v2424_v39, %v1697_v31  ;;  %vm1704_vm7 = vweird.f32 %v2424_v39 }
 0xb02   :  { %v1473_v34 = vsel %vm1470_vm6, %v1472_v42, %v1468_v49  ;;  %vm1705_vm9 = vmor %vm1703_vm8, %vm1704_vm7 }
 0xb03   :  { %v1700_v43 = vsub.f32 1.0, %v1699_v51  ;;  %v1474_v45 = vmul.f32 %v3039_v11, %v1473_v34 }
 0xb05   :  { %v1701_v47 = vmul.f32 %v2424_v39, %v1700_v43  ;;  %2250 = vmatmul.msk.f32.vlgmr.msra.gmra.mxu2 %vm1205_vm13, %v1474_v45  ;;  %v1475_v11 = vadd.f32 %v1474_v45, %v3037_v35 }
 0xb06   :  { %1737 = vmatpush.msra.mxu2 %v2347_v37 }
 0xb07   :  { %v1702_v52 = vadd.f32 %v2424_v39, %v1701_v47 }
 0xb08   :  { %1738 = vmatpush.msra.mxu2 %v2348_v4 }
 0xb09   :  { %v1706_v46 = vsel %vm1705_vm9, %v2424_v39, %v1702_v52 }
 0xb0a   :  { %v1711_v3 = vsel %vm1708_vm10, %v1710_v55, %v1706_v46  ;;  %vm2077_vm10 = vcmask 523264  }
 0xb0b   :  { %v1712_v50 = vmul.f32 %v3049_v10, %v1711_v3 }
 0xb0c   :  { %v1778_v38 = vpop.permute.xlu0 %1777 }
 0xb0d   :  { %2258 = vmatmul.msk.f32.vlgmr.msrb.gmra.mxu2 %vm1205_vm13, %v1626_v53  ;;  %2267 = vmatmul.msk.f32.vlgmr.msra.gmra.mxu0 %vm209_vm1, %v1778_v38  ;;  %v3075_v56 = vadd.f32 %v1712_v50, %v1475_v11 }
 0xb0e   :  { %2269 = vmatpush.xpose.msk.msrb.mxu2 %vm209_vm1, %v1868_v9 }
 0xb12   :  { %2270 = vmatpush.xpose.msk.msrb.mxu2 %vm209_vm1, %v1866_v54 }
 0xb15   :  { %2262 = vmatmul.msk.f32.vlgmr.msra.gmra.mxu2 %vm1205_vm13, %v1712_v50 }
 0xb1d   :  { %2271 = vmatmul.msk.f32.vlgmr.msrb.gmra.mxu2 %vm209_vm1, %v1864_v40 }
 0xb60   :  { %v1416_v35 = vpop.f32.mrf.mxu0 }
 0xb68   :  { %v3081_v57 = vpop.f32.mrf.mxu0 }
 0xb78   :  { %v3083_v10 = vpop.f32.mrf.mxu0 }
 0xb88   :  { %v3085_v41 = vpop.f32.mrf.mxu2 }
 0xb8a   :  { %v1806_v59 = vpop.f32.mrf.mxu0 }
 0xb8b   :  { %v1809_v61 = vsel %vm1205_vm13, %v1806_v59, -inf }
 0xb8c   :  { %1810 = vmax.xlane.f32.xlu0 %v1809_v61 }
 0xb90   :  { %v3088_v62 = vpop.f32.mrf.mxu2 }
 0xb98   :  { %v3090_v28 = vpop.f32.mrf.mxu2 }
 0xba0   :  { %v1892_v6 = vpop.f32.mrf.mxu2 }
 0xba1   :  { %v1895_v12 = vsel %vm1205_vm13, %v1892_v6, -inf }
 0xba2   :  { %1896 = vmax.xlane.f32.xlu2 %v1895_v12 }
 0xbba   :  { %2350 = vrot.lane.b32.xlu2 %v2999_v29, %s2473_s21 }
 0xbc2   :  { %1949 = vrot.lane.b32.xlu2 %v2787_v14, %s2474_s22 }
 0xbff   :  { %v1811_v18 = vpop.xlane.xlu0 %1810 }
 0xc00   :  { %v1812_v19 = vsub.f32 %v1806_v59, %v1811_v18 }
 0xc02   :  { %v1813_v13 = vmul.f32 1.442695, %v1812_v19 }
 0xc04   :  { %2425 = vpow2.f32 %v1813_v13 }
 0xc0a   :  { %v2426_v22 = vpop.eup %2425 }
 0xc0b   :  { %v1815_v23 = vsel %vm1205_vm13, %v2426_v22, 0.0 }
 0xc0c   :  { %1816 = vadd.xlane.f32.xlu1 %v1815_v23 }
 0xc15   :  { %v1897_v9 = vpop.xlane.xlu2 %1896 }
 0xc16   :  { %v1898_v25 = vsub.f32 %v1892_v6, %v1897_v9 }
 0xc18   :  { %v1899_v53 = vmul.f32 1.442695, %v1898_v25 }
 0xc1a   :  { %2427 = vpow2.f32 %v1899_v53 }
 0xc1d   :  { %v2351_v26 = vpop.permute.xlu2 %2350 }
 0xc1e   :  { %v2352_v1 = vunpack.i.l.bf16 %v2351_v26  ;;  %v2353_v8 = vunpack.i.h.bf16 %v2351_v26 }
 0xc20   :  { %v2428_v2 = vpop.eup %2427  ;;  %1857 = vmatpush.msra.mxu1 %v2352_v1 }
 0xc21   :  { %v1901_v29 = vsel %vm1205_vm13, %v2428_v2, 0.0 }
 0xc22   :  { %1902 = vadd.xlane.f32.xlu0 %v1901_v29  ;;  %1858 = vmatpush.msra.mxu1 %v2353_v8 }
 0xc25   :  { %1507 = vrot.lane.b32.xlu1 %v2799_v7, %s2474_s22  ;;  %v1950_v51 = vpop.permute.xlu2 %1949 }
 0xc26   :  { %1973 = vmatpush.msrb.mxu1 %v1950_v51 }
 0xc2d   :  { %1983 = vrot.lane.b32.xlu1 %v2877_v58, %s2474_s22 }
 0xc36   :  { %2355 = vrot.lane.b32.xlu0 %v3009_v44, %s2473_s21  ;;  %s2173_s21 = sshll.u32 %s3220_s15, 4  ;;  %s2174_s21 = int_to_ptr.hbm [resolvable:$true] %s2173_s21 }
 0xc3e   :  { %1743 = vrot.lane.b32.xlu0 %v2793_v36, %s2474_s22  ;;  %s2477_s22 = smov 128  }
 0xc7f   :  { %v1817_v14 = vpop.xlane.xlu1 %1816 }
 0xc80   :  { %2429 = vrcp.f32 %v1817_v14  ;;  %v1829_v24 = vand.u32 2147483648, %v1817_v14  ;;  %v1827_v17 = vand.u32 2147483647, %v1817_v14  ;;  %vm1823_vm12 = vweird.f32 %v1817_v14 }
 0xc82   :  { %v1830_v7 = vor.u32 1.1754944e-38, %v1829_v24  ;;  %vm1828_vm15 = vcmp.eq.f32.partialorder %v1827_v17, 8.507059e+37  ;;  %v73_v17 = vld [vmem:[%s3213_s8 + $0x8] sm:$0xff] }
 0xc86   :  { %v2430_v30 = vpop.eup %2429 }
 0xc87   :  { %v1819_v31 = vmul.f32 %v2430_v30, %v1817_v14  ;;  %vm1824_vm11 = vweird.f32 %v2430_v30 }
 0xc88   :  { %vm1825_vm14 = vmor %vm1823_vm12, %vm1824_vm11 }
 0xc89   :  { %v1820_v16 = vsub.f32 1.0, %v1819_v31 }
 0xc8b   :  { %v1821_v60 = vmul.f32 %v2430_v30, %v1820_v16 }
 0xc8d   :  { %v1822_v21 = vadd.f32 %v2430_v30, %v1821_v60  ;;  %v74_v60 = vld [vmem:[%s3213_s8 + $0x10] sm:$0xff] }
 0xc8f   :  { %v1826_v58 = vsel %vm1825_vm14, %v2430_v30, %v1822_v21  ;;  %v72_v21 = vld [vmem:[%s3213_s8] sm:$0xff] }
 0xc90   :  { %v1831_v0 = vsel %vm1828_vm15, %v1830_v7, %v1826_v58 }
 0xc91   :  { %v1832_v44 = vmul.f32 %v2426_v22, %v1831_v0 }
 0xc93   :  { %v1833_v39 = vadd.f32 %v1832_v44, %v3063_v33  ;;  %2268 = vmatmul.msk.f32.vlgmr.msra.gmra.mxu1 %vm1205_vm13, %v1832_v44 }
 0xc95   :  { %v1903_v36 = vpop.xlane.xlu0 %1902  ;;  %v2161_v42 = vmul.f32 0.25, %v1833_v39 }
 0xc96   :  { %2431 = vrcp.f32 %v1903_v36  ;;  %v1915_v37 = vand.u32 2147483648, %v1903_v36  ;;  %v1913_v33 = vand.u32 2147483647, %v1903_v36  ;;  %vm1909_vm3 = vweird.f32 %v1903_v36 }
 0xc97   :  { %v1508_v49 = vpop.permute.xlu1 %1507  ;;  %2163 = vst.msk [vmem:[#allocation2] sm:$0xff] %vm1205_vm13, %v2161_v42 }
 0xc98   :  { %1531 = vmatpush.msra.mxu3 %v1508_v49  ;;  %v1916_v48 = vor.u32 1.1754944e-38, %v1915_v37  ;;  %vm1914_vm5 = vcmp.eq.f32.partialorder %v1913_v33, 8.507059e+37  ;;  %v2037_v37 = vperm.slane %v2889_v5, 1  ;;  %v83_v33 = vld [vmem:[%s3215_s10 + $0x30] sm:$0xff]  ;;  %v81_v5 = vld [vmem:[%s3215_s10 + $0x20] sm:$0xff] }
 0xc99   :  { %2251 = vmatmul.msk.f32.vlgmr.msra.gmra.mxu3 %vm209_vm1, %v1416_v35 }
 0xc9c   :  { %v2432_v34 = vpop.eup %2431 }
 0xc9d   :  { %v1905_v43 = vmul.f32 %v2432_v34, %v1903_v36  ;;  %vm1910_vm2 = vweird.f32 %v2432_v34 }
 0xc9e   :  { %vm1911_vm4 = vmor %vm1909_vm3, %vm1910_vm2 }
 0xc9f   :  { %v1906_v45 = vsub.f32 1.0, %v1905_v43  ;;  %v1984_v18 = vpop.permute.xlu1 %1983 }
 0xca1   :  { %v1907_v15 = vmul.f32 %v2432_v34, %v1906_v45  ;;  %2252 = vmatmul.msk.f32.gmra.mxu3 %vm209_vm1, %v3085_v41 }
 0xca3   :  { %v1908_v47 = vadd.f32 %v2432_v34, %v1907_v15  ;;  %v84_v15 = vld [vmem:[%s3215_s10 + $0x38] sm:$0xff] }
 0xca5   :  { %v1912_v4 = vsel %vm1911_vm4, %v2432_v34, %v1908_v47  ;;  %v2034_v34 = vperm.slane %v2884_v63, 1 }
 0xca6   :  { %v1917_v52 = vsel %vm1914_vm5, %v1916_v48, %v1912_v4  ;;  %v82_v48 = vld [vmem:[%s3215_s10 + $0x28] sm:$0xff] }
 0xca7   :  { %v1918_v55 = vmul.f32 %v2428_v2, %v1917_v52 }
 0xca8   :  { %v2356_v46 = vpop.permute.xlu0 %2355 }
 0xca9   :  { %v2357_v3 = vunpack.i.l.bf16 %v2356_v46  ;;  %v1919_v11 = vadd.f32 %v1918_v55, %v3075_v56  ;;  %v2358_v50 = vunpack.i.h.bf16 %v2356_v46  ;;  %v80_v46 = vld [vmem:[%s3215_s10 + $0x18] sm:$0xff] }
 0xcab   :  { %1943 = vmatpush.msrb.mxu0 %v2357_v3  ;;  %v2162_v38 = vmul.f32 0.25, %v1919_v11 }
 0xcad   :  { %1944 = vmatpush.msrb.mxu0 %v2358_v50  ;;  %2164 = vst.msk [vmem:[#allocation2 + $0x8] sm:$0xff] %vm1205_vm13, %v2162_v38 }
 0xcae   :  { %2272 = vmatmul.msk.f32.vlgmr.msrb.gmra.mxu0 %vm1205_vm13, %v1918_v55 }
 0xcb0   :  { %v1744_v54 = vpop.permute.xlu0 %1743 }
 0xcb1   :  { %1767 = vmatpush.msrb.mxu3 %v1744_v54 }
 0xcb2   :  { %2263 = vmatmul.msk.f32.vlgmr.msrb.gmra.mxu3 %vm209_vm1, %v3088_v62 }
 0xcb3   :  { %2092 = vmatpush.msra.mxu3 %v84_v15 }
 0xcb5   :  { %2093 = vmatpush.msra.mxu3 %v83_v33 }
 0xcb7   :  { %2094 = vmatpush.msra.mxu3 %v82_v48 }
 0xcb9   :  { %2095 = vmatpush.msra.mxu3 %v81_v5 }
 0xcba   :  { %2264 = vmatmul.msk.f32.gmra.mxu3 %vm209_vm1, %v3090_v28 }
 0xcbb   :  { %2096 = vmatpush.msra.mxu3 %v80_v46 }
 0xd10   :  { %v1860_v40 = vpop.f32.mrf.mxu1 }
 0xd11   :  { %2273 = vmatmul.msk.f32.vlgmr.msrb.gmra.mxu1 %vm209_vm1, %v1860_v40 }
 0xd1c   :  { %v1533_v35 = vpop.f32.mrf.mxu3 }
 0xd1d   :  { %v1566_v61 = vadd.f32 %v3081_v57, %v1533_v35 }
 0xd24   :  { %v1536_v41 = vpop.f32.mrf.mxu3 }
 0xd25   :  { %v1569_v23 = vadd.f32 %v3083_v10, %v1536_v41 }
 0xd2b   :  { %v1946_v56 = vpop.f32.mrf.mxu0 }
 0xd2c   :  { %2274 = vmatmul.msk.f32.gmra.mxu1 %vm209_vm1, %v1946_v56 }
 0xd35   :  { %v1769_v59 = vpop.f32.mrf.mxu3 }
 0xd36   :  { %v1775_v6 = vadd.f32 %v1769_v59, %v1566_v61  ;;  %v79_v61 = vld [vmem:[%s3215_s10 + $0x10] sm:$0xff] }
 0xd37   :  { %2097 = vmatpush.msra.mxu3 %v79_v61 }
 0xd3d   :  { %v1772_v22 = vpop.f32.mrf.mxu3 }
 0xd3e   :  { %v1776_v9 = vadd.f32 %v1772_v22, %v1569_v23 }
 0xd8e   :  { %v1975_v12 = vpop.f32.mrf.mxu1 }
 0xd8f   :  { %v1981_v19 = vadd.f32 %v1975_v12, %v1775_v6  ;;  %v78_v6 = vld [vmem:[%s3215_s10 + $0x8] sm:$0xff]  ;;  %v77_v12 = vld [vmem:[%s3215_s10] sm:$0xff] }
 0xd90   :  { %2098 = vmatpush.msra.mxu3 %v78_v6 }
 0xd91   :  { %v1986_v13 = vadd.f32 %v1984_v18, %v1981_v19 }
 0xd92   :  { %2099 = vmatpush.msra.mxu3 %v77_v12 }
 0xd93   :  { %v1988_v62 = vadd.f32 %v1986_v13, %v2893_v20 }
 0xd95   :  { %v1990_v28 = vsel %vm93_vm0, %v1988_v62, 0.0 }
 0xd96   :  { %1991 = vadd.xlane.f32.xlu0 %v1990_v28 }
 0xda9   :  { %v1978_v25 = vpop.f32.mrf.mxu1 }
 0xdaa   :  { %v1982_v53 = vadd.f32 %v1978_v25, %v1776_v9  ;;  %v2362_v9 = vld [vmem:[%s3216_s11] ss:$0 sm:$0xff] }
 0xdac   :  { %v1987_v26 = vadd.f32 %v1984_v18, %v1982_v53  ;;  %v2361_v18 = vld [vmem:[%s3214_s9] ss:$0 sm:$0xff]  ;;  %s2476_s9 = smov [#allocation2]  }
 0xdad   :  { %s2171_s10 = sshll.u32 %s2476_s9, 4  ;;  %s2172_s10 = int_to_ptr.vmem [resolvable:$true] %s2171_s10 }
 0xdae   :  { %v1989_v1 = vadd.f32 %v1987_v26, %v2904_v32  ;;  %v75_v32 = vld [vmem:[%s3213_s8 + $0x18] sm:$0xff] }
 0xdaf   :  { %2061 = vmatpush.msra.mxu2 %v75_v32  ;;  %2179 = dma.vmem_to_hbm [thread:$0]  %s2172_s10, 256, %s2174_s21, [#allocation3], %s2477_s22, %s2477_s22, %s2478_s23  }
 0xdb0   :  { %v1993_v57 = vsel %vm93_vm0, %v1989_v1, 0.0 }
 0xdb1   :  { %1994 = vadd.xlane.f32.xlu2 %v1993_v57  ;;  %2062 = vmatpush.msra.mxu2 %v74_v60 }
 0xdb3   :  { %2063 = vmatpush.msra.mxu2 %v73_v17 }
 0xdb5   :  { %2064 = vmatpush.msra.mxu2 %v72_v21 }
 0xe09   :  { %v1992_v2 = vpop.xlane.xlu0 %1991 }
 0xe0a   :  { %v1996_v8 = vmul.f32 %v1992_v2, %v2823_v27 }
 0xe0c   :  { %v1998_v29 = vsub.f32 %v1988_v62, %v1996_v8 }
 0xe0e   :  { %v2000_v20 = vmul.f32 %v1998_v29, %v1998_v29 }
 0xe10   :  { %v2002_v14 = vsel %vm93_vm0, %v2000_v20, 0.0 }
 0xe11   :  { %2003 = vadd.xlane.f32.xlu1 %v2002_v14 }
 0xe24   :  { %v1995_v30 = vpop.xlane.xlu2 %1994 }
 0xe25   :  { %v1997_v10 = vmul.f32 %v1995_v30, %v2823_v27 }
 0xe27   :  { %v1999_v31 = vsub.f32 %v1989_v1, %v1997_v10 }
 0xe29   :  { %v2001_v16 = vmul.f32 %v1999_v31, %v1999_v31 }
 0xe2b   :  { %v2005_v24 = vsel %vm93_vm0, %v2001_v16, 0.0 }
 0xe2c   :  { %2006 = vadd.xlane.f32.xlu0 %v2005_v24 }
 0xe84   :  { %v2004_v7 = vpop.xlane.xlu1 %2003 }
 0xe85   :  { %v2008_v58 = vmul.f32 %v2004_v7, %v2823_v27 }
 0xe87   :  { %v2010_v0 = vadd.f32 1e-05, %v2008_v58 }
 0xe89   :  { %2433 = vrsqrt.f32 %v2010_v0  ;;  %vm2018_vm13 = vweird.f32 %v2010_v0 }
 0xe8f   :  { %v2434_v44 = vpop.eup %2433 }
 0xe90   :  { %v2013_v39 = vmul.f32 %v2434_v44, %v2010_v0  ;;  %vm2019_vm1 = vweird.f32 %v2434_v44 }
 0xe91   :  { %vm2020_vm6 = vmor %vm2018_vm13, %vm2019_vm1 }
 0xe92   :  { %v2014_v36 = vmul.f32 %v2434_v44, %v2013_v39 }
 0xe94   :  { %v2015_v42 = vmul.f32 0.5, %v2014_v36 }
 0xe96   :  { %v2016_v49 = vsub.f32 1.5, %v2015_v42 }
 0xe98   :  { %v2017_v51 = vmul.f32 %v2434_v44, %v2016_v49 }
 0xe9a   :  { %v2021_v43 = vsel %vm2020_vm6, %v2434_v44, %v2017_v51  ;;  %v2441_v51 = vld [vmem:[%s3217_s12] sm:$0x7] }
 0xe9b   :  { %v2032_v45 = vmul.f32 %v2021_v43, %v1998_v29 }
 0xe9d   :  { %v2035_v47 = vmul.f32 %v2034_v34, %v2032_v45  ;;  %v2442_v45 = vld [vmem:[%s3218_s13] sm:$0x7] }
 0xe9f   :  { %v2007_v63 = vpop.xlane.xlu0 %2006  ;;  %v2038_v4 = vadd.f32 %v2037_v37, %v2035_v47 }
 0xea0   :  { %v2009_v52 = vmul.f32 %v2007_v63, %v2823_v27 }
 0xea1   :  { %2275 = vmatmul.msk.f32.vlgmr.msra.gmra.mxu2 %vm93_vm0, %v2038_v4 }
 0xea2   :  { %v2011_v55 = vadd.f32 1e-05, %v2009_v52 }
 0xea4   :  { %2435 = vrsqrt.f32 %v2011_v55  ;;  %vm2028_vm8 = vweird.f32 %v2011_v55 }
 0xeaa   :  { %v2436_v3 = vpop.eup %2435 }
 0xeab   :  { %v2023_v11 = vmul.f32 %v2436_v3, %v2011_v55  ;;  %vm2029_vm7 = vweird.f32 %v2436_v3 }
 0xeac   :  { %vm2030_vm9 = vmor %vm2028_vm8, %vm2029_vm7 }
 0xead   :  { %v2024_v50 = vmul.f32 %v2436_v3, %v2023_v11 }
 0xeaf   :  { %v2025_v38 = vmul.f32 0.5, %v2024_v50 }
 0xeb1   :  { %v2026_v54 = vsub.f32 1.5, %v2025_v38 }
 0xeb3   :  { %v2027_v40 = vmul.f32 %v2436_v3, %v2026_v54 }
 0xeb5   :  { %v2031_v56 = vsel %vm2030_vm9, %v2436_v3, %v2027_v40 }
 0xeb6   :  { %v2033_v35 = vmul.f32 %v2031_v56, %v1999_v31 }
 0xeb8   :  { %v2036_v41 = vmul.f32 %v2034_v34, %v2033_v35  ;;  %v2153_v34 = vperm.slane %v2441_v51, 2 }
 0xeba   :  { %v2039_v59 = vadd.f32 %v2037_v37, %v2036_v41  ;;  %v2156_v37 = vperm.slane %v2442_v45, 2 }
 0xebc   :  { %2276 = vmatmul.msk.f32.gmra.mxu2 %vm93_vm0, %v2039_v59 }
 0xf24   :  { %v2066_v19 = vpop.f32.mrf.mxu2 }
 0xf25   :  { %v2067_v13 = vadd.f32 %v2361_v18, %v2066_v19 }
 0xf27   :  { %v2072_v62 = vmax.f32 %v2067_v13, 0.0 }
 0xf29   :  { %2277 = vmatmul.msk.f32.vlgmr.msra.gmra.mxu3 %vm2077_vm10, %v2072_v62 }
 0xf3f   :  { %v2069_v28 = vpop.f32.mrf.mxu2 }
 0xf40   :  { %v2070_v22 = vadd.f32 %v2361_v18, %v2069_v28 }
 0xf42   :  { %v2073_v23 = vmax.f32 %v2070_v22, 0.0 }
 0xf44   :  { %2278 = vmatmul.msk.f32.gmra.mxu3 %vm2077_vm10, %v2073_v23 }
 0xfac   :  { %v2101_v25 = vpop.f32.mrf.mxu3 }
 0xfad   :  { %v2102_v53 = vadd.f32 %v2362_v9, %v2101_v25 }
 0xfaf   :  { %v2107_v26 = vadd.f32 %v2102_v53, %v2038_v4 }
 0xfb1   :  { %v2109_v1 = vsel %vm93_vm0, %v2107_v26, 0.0 }
 0xfb2   :  { %2110 = vadd.xlane.f32.xlu2 %v2109_v1 }
 0xfc7   :  { %v2104_v57 = vpop.f32.mrf.mxu3 }
 0xfc8   :  { %v2105_v2 = vadd.f32 %v2362_v9, %v2104_v57 }
 0xfca   :  { %v2108_v8 = vadd.f32 %v2105_v2, %v2039_v59 }
 0xfcc   :  { %v2112_v29 = vsel %vm93_vm0, %v2108_v8, 0.0 }
 0xfcd   :  { %2113 = vadd.xlane.f32.xlu1 %v2112_v29 }
0x1025   :  { %v2111_v20 = vpop.xlane.xlu2 %2110 }
0x1026   :  { %v2115_v14 = vmul.f32 %v2111_v20, %v2823_v27 }
0x1028   :  { %v2117_v30 = vsub.f32 %v2107_v26, %v2115_v14 }
0x102a   :  { %v2119_v10 = vmul.f32 %v2117_v30, %v2117_v30 }
0x102c   :  { %v2121_v31 = vsel %vm93_vm0, %v2119_v10, 0.0 }
0x102d   :  { %2122 = vadd.xlane.f32.xlu0 %v2121_v31 }
0x1040   :  { %v2114_v16 = vpop.xlane.xlu1 %2113 }
0x1041   :  { %v2116_v24 = vmul.f32 %v2114_v16, %v2823_v27 }
0x1043   :  { %v2118_v32 = vsub.f32 %v2108_v8, %v2116_v24 }
0x1045   :  { %v2120_v60 = vmul.f32 %v2118_v32, %v2118_v32 }
0x1047   :  { %v2124_v17 = vsel %vm93_vm0, %v2120_v60, 0.0 }
0x1048   :  { %2125 = vadd.xlane.f32.xlu2 %v2124_v17 }
0x10a0   :  { %v2123_v21 = vpop.xlane.xlu0 %2122 }
0x10a1   :  { %v2127_v7 = vmul.f32 %v2123_v21, %v2823_v27 }
0x10a3   :  { %v2129_v58 = vadd.f32 1e-05, %v2127_v7 }
0x10a5   :  { %2437 = vrsqrt.f32 %v2129_v58  ;;  %vm2137_vm12 = vweird.f32 %v2129_v58 }
0x10ab   :  { %v2438_v0 = vpop.eup %2437 }
0x10ac   :  { %v2132_v44 = vmul.f32 %v2438_v0, %v2129_v58  ;;  %vm2138_vm11 = vweird.f32 %v2438_v0 }
0x10ad   :  { %vm2139_vm14 = vmor %vm2137_vm12, %vm2138_vm11 }
0x10ae   :  { %v2133_v39 = vmul.f32 %v2438_v0, %v2132_v44 }
0x10b0   :  { %v2134_v36 = vmul.f32 0.5, %v2133_v39 }
0x10b2   :  { %v2135_v42 = vsub.f32 1.5, %v2134_v36 }
0x10b4   :  { %v2136_v49 = vmul.f32 %v2438_v0, %v2135_v42 }
0x10b6   :  { %v2140_v43 = vsel %vm2139_vm14, %v2438_v0, %v2136_v49 }
0x10b7   :  { %v2151_v15 = vmul.f32 %v2140_v43, %v2117_v30 }
0x10b9   :  { %v2154_v33 = vmul.f32 %v2153_v34, %v2151_v15 }
0x10bb   :  { %v2157_v47 = vadd.f32 %v2156_v37, %v2154_v33  ;;  %v2126_v48 = vpop.xlane.xlu2 %2125 }
0x10bc   :  { %v2128_v63 = vmul.f32 %v2126_v48, %v2823_v27 }
0x10bd   :  { %2159 = vst.msk [vmem:[%s3219_s14] sm:$0xff] %vm93_vm0, %v2157_v47 }
0x10be   :  { %v2130_v4 = vadd.f32 1e-05, %v2128_v63 }
0x10c0   :  { %2439 = vrsqrt.f32 %v2130_v4  ;;  %vm2147_vm2 = vweird.f32 %v2130_v4 }
0x10c6   :  { %v2440_v52 = vpop.eup %2439 }
0x10c7   :  { %v2142_v5 = vmul.f32 %v2440_v52, %v2130_v4  ;;  %vm2148_vm15 = vweird.f32 %v2440_v52 }
0x10c8   :  { %vm2149_vm3 = vmor %vm2147_vm2, %vm2148_vm15 }
0x10c9   :  { %v2143_v55 = vmul.f32 %v2440_v52, %v2142_v5 }
0x10cb   :  { %v2144_v46 = vmul.f32 0.5, %v2143_v55 }
0x10cd   :  { %v2145_v3 = vsub.f32 1.5, %v2144_v46 }
0x10cf   :  { %v2146_v11 = vmul.f32 %v2440_v52, %v2145_v3 }
0x10d1   :  { %v2150_v50 = vsel %vm2149_vm3, %v2440_v52, %v2146_v11 }
0x10d2   :  { %v2152_v38 = vmul.f32 %v2150_v50, %v2118_v32 }
0x10d4   :  { %v2155_v54 = vmul.f32 %v2153_v34, %v2152_v38 }
0x10d6   :  { %v2158_v27 = vadd.f32 %v2156_v37, %v2155_v54 }
0x10d8   :  { %2160 = vst.msk [vmem:[%s3219_s14 + $0x8] sm:$0xff] %vm93_vm0, %v2158_v27 }
0x10d9   :  { %2467 = dma.done.wait [#allocation3], 256  }
0x10da   :  { %2468 = vsyncadd [#allocation3], 4294967040 }
0x10db   :  { %2186 = vsyncpa [#allocation3], 1 }

</bundles_post_ra>
